<compile_context>
chip_gen: v7x
topology: tpu7x:2x2x1
jax: 0.10.0
libtpu: 0.0.40
codegen_flags: <defaults>
</compile_context>

<pallas_src>
import math

import jax
import jax.numpy as jnp
from jax.experimental import pallas as pl
from jax.experimental.pallas import tpu as pltpu

PI = math.acos(0.0) * 2.0  # same construction as torch.acos(torch.zeros(1)) * 2


def _fcn_kernel(use_ff,
                r_ref, B_ref, bf_ref,
                w0_ref, b0_ref,
                wh_ref, bh_ref,
                we_ref, be_ref,
                out_ref):
    # Transposed layout: x is (features, tile_m); batch lives on the lane axis.
    x = r_ref[...].astype(jnp.float32)

    if use_ff:
        # Fourier features: cos((2*pi*B).T @ x + b.T). 2*pi already folded into B.
        proj = jnp.dot(B_ref[...], x, preferred_element_type=jnp.float32)
        x = jnp.cos(proj + bf_ref[...])

    # fcs: Linear(d_in -> n_hidden) + Tanh   (W0 stored as (out, in))
    x = jnp.tanh(jnp.dot(w0_ref[...], x, preferred_element_type=jnp.float32)
                 + b0_ref[...])

    # fch: (n_layers - 1) x [Linear(n_hidden -> n_hidden) + Tanh]
    # static Python loop (2 layers here); swap to lax.fori_loop(unroll=True)
    # if n_layers grows beyond a handful to bound vreg live ranges.
    for l in range(wh_ref.shape[0]):
        x = jnp.tanh(jnp.dot(wh_ref[l], x, preferred_element_type=jnp.float32)
                     + bh_ref[l])

    # fce: Linear(n_hidden -> n_out), no activation
    y = jnp.dot(we_ref[...], x, preferred_element_type=jnp.float32) + be_ref[...]
    out_ref[...] = y.astype(out_ref.dtype)


def pack_kernel_params(params, *, n_ffeatures):
    """One-time, host-side repack: transpose to (out, in) / column biases and
    fold the 2*pi factor into B. Call once, reuse for every forward."""
    use_ff = n_ffeatures != 0
    return {
        "Bt": (2.0 * PI * params["B"]).T if use_ff else None,   # (F, n_in)
        "bft": params["b"].T if use_ff else None,               # (F, 1)
        "w0t": params["w0"].T,                                  # (H, d_in)
        "b0t": params["b0"].T,                                  # (H, 1)
        "wht": jnp.swapaxes(params["wh"], -1, -2),              # (L-1, H, H)
        "bht": jnp.swapaxes(params["bh"], -1, -2),              # (L-1, H, 1)
        "wet": params["we"].T,                                  # (n_out, H)
        "bet": params["be"].T,                                  # (n_out, 1)
    }


def fcn_forward(r, kparams, *, n_ffeatures, tile_m=512):
    """FCN forward via a Pallas TPU kernel, batch-on-lanes layout, tiled over batch."""
    N, n_in = r.shape
    n_out = kparams["wet"].shape[0]
    assert tile_m % 128 == 0, "tile_m must be a multiple of 128 (lane-dense tiles)"

    # Batch on the lane (last) axis; pad to a multiple of tile_m, slice off later.
    r_t = r.T                                  # (n_in, N)
    n_pad = (-N) % tile_m
    if n_pad:
        r_t = jnp.pad(r_t, ((0, 0), (0, n_pad)))
    Np = N + n_pad
    grid = (Np // tile_m,)

    def full(arr):
        return pl.BlockSpec(arr.shape, lambda i, _nd=arr.ndim: (0,) * _nd)

    use_ff = n_ffeatures != 0
    if use_ff:
        ff_args = (kparams["Bt"], kparams["bft"])
        ff_specs = [full(kparams["Bt"]), full(kparams["bft"])]
        kernel = lambda r_, B_, bf_, w0_, b0_, wh_, bh_, we_, be_, o_: _fcn_kernel(
            True, r_, B_, bf_, w0_, b0_, wh_, bh_, we_, be_, o_)
    else:
        ff_args = ()
        ff_specs = []
        kernel = lambda r_, w0_, b0_, wh_, bh_, we_, be_, o_: _fcn_kernel(
            False, r_, None, None, w0_, b0_, wh_, bh_, we_, be_, o_)

    weight_args = (kparams["w0t"], kparams["b0t"],
                   kparams["wht"], kparams["bht"],
                   kparams["wet"], kparams["bet"])

    # VMEM guard: whole weight blocks are resident (double-buffered by BlockSpec).
    # Keep well under the v7x scoped default (32 MiB of its 64 MiB VMEM); at
    # n_hidden=32 this is a few KB. If n_hidden grows, tile hidden layers over a
    # grid axis (or use pipeline_mode=pl.Buffered(1) on the constant weight specs).
    w_bytes = sum(a.size * a.dtype.itemsize for a in ff_args + weight_args)
    act_bytes = 4 * tile_m * max(kparams["w0t"].shape[0], n_in, n_out)
    assert 2 * (w_bytes + act_bytes) < 24 * 1024 * 1024, \
        "weights/activations too large for resident VMEM; tile over layers"

    out_t = pl.pallas_call(
        kernel,
        out_shape=jax.ShapeDtypeStruct((n_out, Np), r.dtype),
        grid_spec=pltpu.PrefetchScalarGridSpec(
            num_scalar_prefetch=0,
            grid=grid,
            in_specs=[pl.BlockSpec((n_in, tile_m), lambda i: (0, i))]  # r tile
                     + ff_specs                                         # Fourier params
                     + [full(a) for a in weight_args],                  # layer weights
            out_specs=pl.BlockSpec((n_out, tile_m), lambda i: (0, i)),  # lane-dense store
        ),
        compiler_params=pltpu.CompilerParams(
            dimension_semantics=("parallel",),
        ),
    )(r_t, *ff_args, *weight_args)

    return out_t[:, :N].T                      # back to (N, n_out)


def fcn_reference(r, params, *, n_ffeatures):
    """Pure-JAX reference (mirrors the torch forward) for correctness check."""
    x = r
    if n_ffeatures != 0:
        x = jnp.cos(2.0 * PI * (x @ params["B"]) + params["b"])
    x = jnp.tanh(x @ params["w0"] + params["b0"])
    for l in range(params["wh"].shape[0]):
        x = jnp.tanh(x @ params["wh"][l] + params["bh"][l])
    return x @ params["we"] + params["be"]


def init_params(key, n_in, n_out, n_ffeatures, n_hidden, n_layers):
    ks = jax.random.split(key, 8)
    f32 = jnp.float32
    d_in = n_ffeatures if n_ffeatures != 0 else n_in
    return {
        # Fourier feature params (B ~ N(0,1), b ~ N(0,1)) as in the torch module
        "B": jax.random.normal(ks[0], (n_in, max(n_ffeatures, 1)), f32),
        "b": jax.random.normal(ks[1], (1, max(n_ffeatures, 1)), f32),
        # Linear layers stored as (in, out) for the reference; deterministic init
        "w0": jax.random.normal(ks[2], (d_in, n_hidden), f32) / jnp.sqrt(f32(d_in)),
        "b0": jax.random.normal(ks[3], (1, n_hidden), f32) * 0.1,
        "wh": jax.random.normal(ks[4], (n_layers - 1, n_hidden, n_hidden), f32)
              / jnp.sqrt(f32(n_hidden)),
        "bh": jax.random.normal(ks[5], (n_layers - 1, 1, n_hidden), f32) * 0.1,
        "we": jax.random.normal(ks[6], (n_hidden, n_out), f32) / jnp.sqrt(f32(n_hidden)),
        "be": jax.random.normal(ks[7], (1, n_out), f32) * 0.1,
    }


if __name__ == "__main__":
    key = jax.random.PRNGKey(0)

    # --- Case 1: with Fourier features ------------------------------------
    n_in, n_out = 2, 1
    n_ffeatures, n_hidden, n_layers = 16, 32, 3
    batch, tile_m = 1024, 512          # 2 tiles -> both v7x TensorCores get work

    k_r, k_p, k_r2, k_p2 = jax.random.split(key, 4)
    r = jax.random.normal(k_r, (batch, n_in), jnp.float32)
    params = init_params(k_p, n_in, n_out, n_ffeatures, n_hidden, n_layers)
    kparams = pack_kernel_params(params, n_ffeatures=n_ffeatures)

    out = fcn_forward(r, kparams, n_ffeatures=n_ffeatures, tile_m=tile_m)
    out = jax.block_until_ready(out)
    ref = fcn_reference(r, params, n_ffeatures=n_ffeatures)
    assert out.shape == (batch, n_out)
    assert jnp.allclose(out, ref, rtol=1e-3, atol=1e-3), "mismatch vs reference (FF)"

    # --- Case 2: no Fourier features (exercise the other trace-time branch) --
    n_ffeatures2 = 0
    batch2, tile_m2 = 512, 256
    r2 = jax.random.normal(k_r2, (batch2, n_in), jnp.float32)
    params2 = init_params(k_p2, n_in, n_out, n_ffeatures2, n_hidden, n_layers)
    kparams2 = pack_kernel_params(params2, n_ffeatures=n_ffeatures2)

    out2 = fcn_forward(r2, kparams2, n_ffeatures=n_ffeatures2, tile_m=tile_m2)
    out2 = jax.block_until_ready(out2)
    ref2 = fcn_reference(r2, params2, n_ffeatures=n_ffeatures2)
    assert out2.shape == (batch2, n_out)
    assert jnp.allclose(out2, ref2, rtol=1e-3, atol=1e-3), "mismatch vs reference (no-FF)"

    print("KERNEL_OK")
</pallas_src>

<mosaic_0001>
module attributes {stable_mosaic.version = 11 : i64} {
  func.func @_lambda_(%arg0: i32, %arg1: memref<2x512xf32, #tpu.memory_space<vmem>>, %arg2: memref<16x2xf32, #tpu.memory_space<vmem>>, %arg3: memref<16x1xf32, #tpu.memory_space<vmem>>, %arg4: memref<32x16xf32, #tpu.memory_space<vmem>>, %arg5: memref<32x1xf32, #tpu.memory_space<vmem>>, %arg6: memref<2x32x32xf32, #tpu.memory_space<vmem>>, %arg7: memref<2x32x1xf32, #tpu.memory_space<vmem>>, %arg8: memref<1x32xf32, #tpu.memory_space<vmem>>, %arg9: memref<1x1xf32, #tpu.memory_space<vmem>>, %arg10: memref<1x512xf32, #tpu.memory_space<vmem>>) attributes {dimension_semantics = [#tpu.dimension_semantics<parallel>], iteration_bounds = array<i64: 2>, scalar_prefetch = 0 : i64, scratch_operands = 0 : i64, tpu.core_type = #tpu.core_type<tc>, window_params = [{transform_indices = @transform_0, window_bounds = array<i64: 2, 512>}, {pipeline_mode = #tpu.pipeline_mode<synchronous>, transform_indices = @transform_1, window_bounds = array<i64: 16, 2>}, {pipeline_mode = #tpu.pipeline_mode<synchronous>, transform_indices = @transform_2, window_bounds = array<i64: 16, 1>}, {pipeline_mode = #tpu.pipeline_mode<synchronous>, transform_indices = @transform_3, window_bounds = array<i64: 32, 16>}, {pipeline_mode = #tpu.pipeline_mode<synchronous>, transform_indices = @transform_4, window_bounds = array<i64: 32, 1>}, {pipeline_mode = #tpu.pipeline_mode<synchronous>, transform_indices = @transform_5, window_bounds = array<i64: 2, 32, 32>}, {pipeline_mode = #tpu.pipeline_mode<synchronous>, transform_indices = @transform_6, window_bounds = array<i64: 2, 32, 1>}, {pipeline_mode = #tpu.pipeline_mode<synchronous>, transform_indices = @transform_7, window_bounds = array<i64: 1, 32>}, {pipeline_mode = #tpu.pipeline_mode<synchronous>, transform_indices = @transform_8, window_bounds = array<i64: 1, 1>}, {transform_indices = @transform_9, window_bounds = array<i64: 1, 512>}]} {
    %c0 = arith.constant 0 : index
    %c0_0 = arith.constant 0 : index
    %0 = vector.load %arg1[%c0, %c0_0] : memref<2x512xf32, #tpu.memory_space<vmem>>, vector<2x512xf32>
    %c0_1 = arith.constant 0 : index
    %c0_2 = arith.constant 0 : index
    %1 = vector.load %arg2[%c0_1, %c0_2] : memref<16x2xf32, #tpu.memory_space<vmem>>, vector<16x2xf32>
    %cst = arith.constant dense<0.000000e+00> : vector<16x512xf32>
    %2 = tpu.matmul %1, %0, %cst {dimension_numbers = #tpu.dot_dimension_numbers<[1], [0], [0], [1], [0, 0, 1, 1], [], []>} : vector<16x2xf32>, vector<2x512xf32>, vector<16x512xf32> -> vector<16x512xf32>
    %c0_3 = arith.constant 0 : index
    %c0_4 = arith.constant 0 : index
    %3 = vector.load %arg3[%c0_3, %c0_4] : memref<16x1xf32, #tpu.memory_space<vmem>>, vector<16x1xf32>
    %4 = vector.broadcast %3 : vector<16x1xf32> to vector<16x512xf32>
    %5 = arith.addf %2, %4 : vector<16x512xf32>
    %6 = math.cos %5 : vector<16x512xf32>
    %c0_5 = arith.constant 0 : index
    %c0_6 = arith.constant 0 : index
    %7 = vector.load %arg4[%c0_5, %c0_6] : memref<32x16xf32, #tpu.memory_space<vmem>>, vector<32x16xf32>
    %cst_7 = arith.constant dense<0.000000e+00> : vector<32x512xf32>
    %8 = tpu.matmul %7, %6, %cst_7 {dimension_numbers = #tpu.dot_dimension_numbers<[1], [0], [0], [1], [0, 0, 1, 1], [], []>} : vector<32x16xf32>, vector<16x512xf32>, vector<32x512xf32> -> vector<32x512xf32>
    %c0_8 = arith.constant 0 : index
    %c0_9 = arith.constant 0 : index
    %9 = vector.load %arg5[%c0_8, %c0_9] : memref<32x1xf32, #tpu.memory_space<vmem>>, vector<32x1xf32>
    %10 = vector.broadcast %9 : vector<32x1xf32> to vector<32x512xf32>
    %11 = arith.addf %8, %10 : vector<32x512xf32>
    %12 = math.tanh %11 : vector<32x512xf32>
    %c0_10 = arith.constant 0 : index
    %c0_11 = arith.constant 0 : index
    %c0_12 = arith.constant 0 : index
    %13 = vector.load %arg6[%c0_10, %c0_11, %c0_12] : memref<2x32x32xf32, #tpu.memory_space<vmem>>, vector<1x32x32xf32>
    %14 = vector.shape_cast %13 : vector<1x32x32xf32> to vector<32x32xf32>
    %cst_13 = arith.constant dense<0.000000e+00> : vector<32x512xf32>
    %15 = tpu.matmul %14, %12, %cst_13 {dimension_numbers = #tpu.dot_dimension_numbers<[1], [0], [0], [1], [0, 0, 1, 1], [], []>} : vector<32x32xf32>, vector<32x512xf32>, vector<32x512xf32> -> vector<32x512xf32>
    %c0_14 = arith.constant 0 : index
    %c0_15 = arith.constant 0 : index
    %c0_16 = arith.constant 0 : index
    %16 = vector.load %arg7[%c0_14, %c0_15, %c0_16] : memref<2x32x1xf32, #tpu.memory_space<vmem>>, vector<1x32x1xf32>
    %17 = vector.shape_cast %16 : vector<1x32x1xf32> to vector<32x1xf32>
    %18 = vector.broadcast %17 : vector<32x1xf32> to vector<32x512xf32>
    %19 = arith.addf %15, %18 : vector<32x512xf32>
    %20 = math.tanh %19 : vector<32x512xf32>
    %c1 = arith.constant 1 : index
    %c0_17 = arith.constant 0 : index
    %c0_18 = arith.constant 0 : index
    %21 = vector.load %arg6[%c1, %c0_17, %c0_18] : memref<2x32x32xf32, #tpu.memory_space<vmem>>, vector<1x32x32xf32>
    %22 = vector.shape_cast %21 : vector<1x32x32xf32> to vector<32x32xf32>
    %cst_19 = arith.constant dense<0.000000e+00> : vector<32x512xf32>
    %23 = tpu.matmul %22, %20, %cst_19 {dimension_numbers = #tpu.dot_dimension_numbers<[1], [0], [0], [1], [0, 0, 1, 1], [], []>} : vector<32x32xf32>, vector<32x512xf32>, vector<32x512xf32> -> vector<32x512xf32>
    %c1_20 = arith.constant 1 : index
    %c0_21 = arith.constant 0 : index
    %c0_22 = arith.constant 0 : index
    %24 = vector.load %arg7[%c1_20, %c0_21, %c0_22] : memref<2x32x1xf32, #tpu.memory_space<vmem>>, vector<1x32x1xf32>
    %25 = vector.shape_cast %24 : vector<1x32x1xf32> to vector<32x1xf32>
    %26 = vector.broadcast %25 : vector<32x1xf32> to vector<32x512xf32>
    %27 = arith.addf %23, %26 : vector<32x512xf32>
    %28 = math.tanh %27 : vector<32x512xf32>
    %c0_23 = arith.constant 0 : index
    %c0_24 = arith.constant 0 : index
    %29 = vector.load %arg8[%c0_23, %c0_24] : memref<1x32xf32, #tpu.memory_space<vmem>>, vector<1x32xf32>
    %cst_25 = arith.constant dense<0.000000e+00> : vector<1x512xf32>
    %30 = tpu.matmul %29, %28, %cst_25 {dimension_numbers = #tpu.dot_dimension_numbers<[1], [0], [0], [1], [0, 0, 1, 1], [], []>} : vector<1x32xf32>, vector<32x512xf32>, vector<1x512xf32> -> vector<1x512xf32>
    %c0_26 = arith.constant 0 : index
    %c0_27 = arith.constant 0 : index
    %31 = vector.load %arg9[%c0_26, %c0_27] : memref<1x1xf32, #tpu.memory_space<vmem>>, vector<1x1xf32>
    %32 = vector.broadcast %31 : vector<1x1xf32> to vector<1x512xf32>
    %33 = arith.addf %30, %32 : vector<1x512xf32>
    %c0_28 = arith.constant 0 : index
    %c0_29 = arith.constant 0 : index
    %34 = vector.load %arg10[%c0_28, %c0_29] : memref<1x512xf32, #tpu.memory_space<vmem>>, vector<1x512xf32>
    tpu.vector_store %arg10[%c0_28, %c0_29], %33 {strides = array<i32>} : memref<1x512xf32, #tpu.memory_space<vmem>>, vector<1x512xf32>,
    return
  }
  func.func @transform_0(%arg0: i32) -> (i32, i32) {
    %c0_i32 = arith.constant 0 : i32
    %c0_i32_0 = arith.constant 0 : i32
    return %c0_i32, %arg0 : i32, i32
  }
  func.func @transform_1(%arg0: i32) -> (i32, i32) {
    %c0_i32 = arith.constant 0 : i32
    %c0_i32_0 = arith.constant 0 : i32
    %c0_i32_1 = arith.constant 0 : i32
    return %c0_i32, %c0_i32_0 : i32, i32
  }
  func.func @transform_2(%arg0: i32) -> (i32, i32) {
    %c0_i32 = arith.constant 0 : i32
    %c0_i32_0 = arith.constant 0 : i32
    %c0_i32_1 = arith.constant 0 : i32
    return %c0_i32, %c0_i32_0 : i32, i32
  }
  func.func @transform_3(%arg0: i32) -> (i32, i32) {
    %c0_i32 = arith.constant 0 : i32
    %c0_i32_0 = arith.constant 0 : i32
    %c0_i32_1 = arith.constant 0 : i32
    return %c0_i32, %c0_i32_0 : i32, i32
  }
  func.func @transform_4(%arg0: i32) -> (i32, i32) {
    %c0_i32 = arith.constant 0 : i32
    %c0_i32_0 = arith.constant 0 : i32
    %c0_i32_1 = arith.constant 0 : i32
    return %c0_i32, %c0_i32_0 : i32, i32
  }
  func.func @transform_5(%arg0: i32) -> (i32, i32, i32) {
    %c0_i32 = arith.constant 0 : i32
    %c0_i32_0 = arith.constant 0 : i32
    %c0_i32_1 = arith.constant 0 : i32
    %c0_i32_2 = arith.constant 0 : i32
    return %c0_i32, %c0_i32_0, %c0_i32_1 : i32, i32, i32
  }
  func.func @transform_6(%arg0: i32) -> (i32, i32, i32) {
    %c0_i32 = arith.constant 0 : i32
    %c0_i32_0 = arith.constant 0 : i32
    %c0_i32_1 = arith.constant 0 : i32
    %c0_i32_2 = arith.constant 0 : i32
    return %c0_i32, %c0_i32_0, %c0_i32_1 : i32, i32, i32
  }
  func.func @transform_7(%arg0: i32) -> (i32, i32) {
    %c0_i32 = arith.constant 0 : i32
    %c0_i32_0 = arith.constant 0 : i32
    %c0_i32_1 = arith.constant 0 : i32
    return %c0_i32, %c0_i32_0 : i32, i32
  }
  func.func @transform_8(%arg0: i32) -> (i32, i32) {
    %c0_i32 = arith.constant 0 : i32
    %c0_i32_0 = arith.constant 0 : i32
    %c0_i32_1 = arith.constant 0 : i32
    return %c0_i32, %c0_i32_0 : i32, i32
  }
  func.func @transform_9(%arg0: i32) -> (i32, i32) {
    %c0_i32 = arith.constant 0 : i32
    %c0_i32_0 = arith.constant 0 : i32
    return %c0_i32, %arg0 : i32, i32
  }
}

</mosaic_0001>

<bundles_post_ra>
// kernel: tpu_custom_call.1
= control target key start
LH: loop header
LB: loop body
LE: loop exit
PB: predicated region body
PF: predicated region fallthrough
CT: control target
= control target key end

     0   :  { %s3802_s0 = inlined_call_operand.vmem [shape: f32[2,1024], index: 0, kind: input, shape index: {}]   ;;  %s3803_s1 = inlined_call_operand.vmem [shape: f32[16,2], index: 1, kind: input, shape index: {}]   ;;  %s3804_s2 = inlined_call_operand.vmem [shape: f32[16,1], index: 2, kind: input, shape index: {}]   ;;  %s3805_s3 = inlined_call_operand.vmem [shape: f32[32,16], index: 3, kind: input, shape index: {}]   ;;  %s3806_s4 = inlined_call_operand.vmem [shape: f32[32,1], index: 4, kind: input, shape index: {}]   ;;  %s3807_s5 = inlined_call_operand.vmem [shape: f32[2,32,32], index: 5, kind: input, shape index: {}]   ;;  %s3808_s6 = inlined_call_operand.vmem [shape: f32[2,32,1], index: 6, kind: input, shape index: {}]   ;;  %s3809_s7 = inlined_call_operand.vmem [shape: f32[1,32], index: 7, kind: input, shape index: {}]   ;;  %s3810_s8 = inlined_call_operand.<no memory space> [shape: f32[1,1], index: 8, kind: input, shape index: {}]   ;;  %s3811_s9 = inlined_call_operand.hbm [shape: f32[1,1024], index: 9, kind: output, shape index: {}]  }
   0x1   :  { %v14_v0 = vstv %s3810_s8 }
   0x2   :  { %15 = vst [vmem:[#allocation2] sm:$0x1] %v14_v0 }
   0x3   :  { %16 = vsyncpa [#allocation4], 0 }
   0x4   :  { %18 = vsyncpa [#allocation4 + $0x1], 0  ;;  %s2816_s11 = smov 0   ;;  %s2818_s12 = smov 0  }
   0x5   :  { %s2820_s13 = smov 0   ;;  %s2822_s14 = smov 0  }
   0x6 LB: > { %s2837_s8 = sadd.s32 4294967295, %s2750_s14   ;;  %s2333_s15 = sadd.s32 4294967294, %s2750_s14   ;;  %s2750_s14 = sphi %s2822_s14, %s3864_s14   ;;  %s2746_s13 = sphi %s2820_s13, %s3863_s13   ;;  %s2742_s12 = sphi %s2818_s12, %s3862_s12   ;;  %s2738_s11 = sphi %s2816_s11, %s3861_s11  }
   0x7   : > { %s2841_s16 = sadd.s32 1, %s2750_s14   ;;  %s225_s17 = sadd.s32 1, %s2746_s13 }
   0x8   : > { %s222_s18 = ssub.s32 %s2750_s14, %s2841_s16  ;;  %p235_p0 = scmp.ne.s32.totalorder %s2746_s13, %s2742_s12 }
   0x9   : > { %p223_p1 = scmp.eq.s32.totalorder %s222_s18, 0  ;;  %p236_p2 = scmp.eq.s32.totalorder %s2837_s8, 1 }
   0xa   : > { %p241_p3 = scmp.ne.s32.totalorder %s2742_s12, %s2738_s11  ;;  %p242_p4 = scmp.eq.s32.totalorder %s2333_s15, 1 }
   0xb   : > { %s2852_s19 = scalar_select %p223_p1, %s2746_s13, %s225_s17  }
   0xc   : > { %p2854_p5 = por %p236_p2, %p235_p0  ;;  %p2858_p6 = por %p242_p4, %p241_p3 }
   0xd   : > { %p2336_p7 = scmp.ge.s32.totalorder %s2750_s14, 1  ;;  %p293_p8 = scmp.lt.s32.totalorder %s2750_s14, 3 }
   0xf   : > { %p294_p9 = pnand %p2336_p7, %p293_p8 }
  0x10   : > { %s2338_s22 = sshll.u32 (!%p294_p9), %s2837_s8, 2  ;;  %v3812_v1 = vlaneseq (!%p294_p9)  ;;  %v2752_v2 = vmov (!%p294_p9), 1983009808   ;;  %v3813_v4 = vmov (!%p294_p9), 0.0   ;;  %v339_v5 = vld [vmem:[%s3804_s2] sm:$0xff] (!%p294_p9)  ;;  %v2754_v7 = vmov (!%p294_p9), 0  }
  0x11   : > { %297 = sbr.rel (%p294_p9) target bundleno = 1438 (0x59e), region = 56  ;;  %p330_p10 = scmp.lt.s32.totalorder (!%p294_p9), %s2338_s22, 7  ;;  %v354_v3 = vunpack.c.l.s4 (!%p294_p9), %v2752_v2  ;;  %449 = vmatprep.mubr.f32.mxu0 (!%p294_p9), %v3813_v4  ;;  %526 = vmatprep.mubr.f32.mxu1 (!%p294_p9), %v3813_v4  ;;  %v340_v9 = vld [vmem:[%s3804_s2 + $0x8] sm:$0xff] (!%p294_p9)  ;;  %v1369_v14 = vld [vmem:[%s3806_s4 + $0x10] sm:$0xff] (!%p294_p9)  ;;  %vm376_vm0 = vcmask (!%p294_p9), 1041408   ;;  %v337_v17 = vld [vmem:[%s3803_s1] sm:$0xff] (!%p294_p9) }
  0x12   : > { %v2871_v6 = vshrl.u32 (!%p294_p9), %v3812_v1, 7  ;;  %2557 = vset.pattern.permute.xlu0 (!%p294_p9), %v2754_v7  ;;  %2558 = vset.pattern.permute.xlu1 (!%p294_p9), %v2754_v7  ;;  %vm369_vm1 = vcmask (!%p294_p9), 15360   ;;  %v1602_v19 = vld [vmem:[%s3808_s6] sm:$0xff] (!%p294_p9)  ;;  %v338_v20 = vld [vmem:[%s3803_s1 + $0x8] sm:$0xff] (!%p294_p9)  ;;  %v1604_v21 = vld [vmem:[%s3808_s6 + $0x10] sm:$0xff] (!%p294_p9)  ;;  %s326_s17 = sand.u32 (!%p294_p9), 1, %s2742_s12  }
  0x13   : > { %v355_v8 = vunpack.c.0.s8 (!%p294_p9), %v354_v3  ;;  %343 = vperm.xlu0 (!%p294_p9), %2557, %v339_v5   ;;  %v2400_v22 = vld [vmem:[%s3808_s6 + $0x20] sm:$0xff] (!%p294_p9)  ;;  %v2402_v23 = vld [vmem:[%s3808_s6 + $0x30] sm:$0xff] (!%p294_p9)  ;;  %v3822_v7 = vmov (!%p294_p9), 683565275   ;;  %s2337_s18 = sshll.u32 (!%p294_p9), %s326_s17, 2  ;;  %s2260_s28 = scalar_lea.sflag (!%p294_p9), [#allocation4], %s326_s17 }
  0x14   : > { %v2070_v24 = vld [vmem:[#allocation2] sm:$0x1] (!%p294_p9)  ;;  %s328_s23 = scalar_lea.vmem (!%p294_p9), [#allocation3], %s2337_s18 }
  0x15   : > { %v358_v10 = vsub.s32 (!%p294_p9), %v355_v8, %v2871_v6  ;;  %s2274_s24 = sshll.u32 (!%p294_p9), %s328_s23, 4  ;;  %s3762_s24 = int_to_ptr.vmem [resolvable:$true] %s2274_s24 }
  0x16   : > { %s2688_s29 = scalar_lea.vmem (!%p294_p9), %s3762_s24, 64 }
  0x17   : > { %348 = vperm.xlu0 (!%p294_p9), %2557, %v340_v9   ;;  %v3820_v9 = vmov (!%p294_p9), 2475754826   ;;  %p2689_p11 = scmp.ne.s32.totalorder (!%p294_p9), %s3762_s24, %s2688_s29 }
  0x18   : > { %s3866_s22 = smov (!%p330_p10, %s2338_s22), 7 }
  0x19   : > { %s2339_s27 = sshll.u32 %s3866_s22, 1  ;;  %s2419_s22 = sshll.u32 %s2837_s8, 6 }
  0x1a   : > { %s333_s30 = scalar_lea.vmem %s3802_s0, %s2339_s27  ;;  %s3760_s27 = scalar_lea.hbm %s3811_s9, %s2419_s22 }
  0x1b   : > { %v336_v11 = vld [vmem:[%s333_s30] sm:$0xff]  ;;  %1383 = vperm.xlu0 %2557, %v1369_v14   ;;  %p2690_p12 = pnand %p2689_p11, %p2854_p5  ;;  %s2762_s8 = smov [#allocation3]  }
  0x1c   : > { %v359_v12 = vrot.slane %v336_v11, %v358_v10  ;;  %v352_v13 = vcombine.high %v336_v11, %v336_v11  ;;  %v3824_v11 = vmov 2131351028   ;;  %s2692_s30 = sshll.u32 %s2762_s8, 4  ;;  %s2693_s30 = int_to_ptr.vmem [resolvable:$false] %s2692_s30 }
  0x1d   : > { %p2691_p13 = pneg %p2690_p12  ;;  %s2694_s10 = scalar_lea.vmem %s2693_s30, 128 }
  0x1e   : > { %v367_v15 = vcombine.high %v359_v12, %v359_v12  ;;  %v366_v16 = vrot.slane %v352_v13, %v358_v10  ;;  %v3826_v13 = vmov 2102212464   ;;  %p2695_p0 = scmp.lt.s32.totalorder %s3762_s24, %s2693_s30  ;;  %p2696_p1 = scmp.lt.s32.totalorder %s2694_s10, %s2688_s29 }
  0x1f   : > { %1608 = vperm.xlu0 %2557, %v1602_v19  }
  0x20   : > { %2340 = vmatprep.subr.msk.mxu0 %vm376_vm0, %v367_v15  ;;  %v368_v18 = vcombine.high %v366_v16, %v366_v16  ;;  %v2759_v15 = vmov 920167782   ;;  %p2697_p2 = por %p2696_p1, %p2695_p0 }
  0x21   : > { %2341 = vmatpush1.msk.msra.mxu0 %vm376_vm0, %v359_v12 }
  0x22   : > { %2342 = vmatmul.mubr.msk.f32.vlgmr.msra.gmra.mrb[0].mxu0 %vm369_vm1, %v337_v17  ;;  %2344 = vmatprep.subr.msk.mxu1 %vm376_vm0, %v368_v18  ;;  %p2698_p3 = pnand %p2697_p2, %p2691_p13 }
  0x23   : > { %2345 = vmatpush1.msk.msra.mxu1 %vm376_vm0, %v366_v16  ;;  %455 = vmatprep.mubr.f32.mxu0 %v3813_v4 }
  0x24   : > { %2346 = vmatmul.mubr.msk.f32.vlgmr.msra.gmra.mrb[0].mxu1 %vm369_vm1, %v337_v17  ;;  %1618 = vperm.xlu0 %2557, %v1604_v21  }
  0x25   : > { %532 = vmatprep.mubr.f32.mxu1 %v3813_v4 }
  0x26   : > { %2343 = vmatmul.mubr.msk.f32.gmra.mrb[2].mxu0 %vm369_vm1, %v338_v20 }
  0x27   : > { %1468 = vmatprep.mubr.f32.mxu0 %v3813_v4 }
  0x28   : > { %2347 = vmatmul.mubr.msk.f32.gmra.mrb[2].mxu1 %vm369_vm1, %v338_v20  ;;  %1845 = vperm.xlu0 %2557, %v2400_v22  }
  0x29   : > { %1557 = vmatprep.mubr.f32.mxu1 %v3813_v4 }
  0x2c   : > { %1855 = vperm.xlu0 %2557, %v2402_v23   ;;  %v2760_v23 = vmov 1326507024  }
  0x30   : > { %2073 = vperm.xlu0 %2557, %v2070_v24  }
  0x92   : > { %v344_v25 = vpop.permute.xlu0 %343 }
  0xf5   : > { %v451_v26 = vpop.f32.mrb[0].mxu0 }
  0xf6   : > { %v2909_v27 = vadd.f32 %v451_v26, %v344_v25  ;;  %v453_v28 = vpop.f32.mrb[1].mxu0 }
  0xf7   : > { %v2911_v29 = vadd.f32 %v453_v28, %v344_v25  ;;  %v528_v30 = vpop.f32.mrb[0].mxu1 }
  0xf8   : > { %v539_v31 = vand.u32 2147483647, %v2909_v27  ;;  %v542_v32 = vand.u32 2139095040, %v2909_v27  ;;  %v2915_v33 = vadd.f32 %v528_v30, %v344_v25  ;;  %v530_v34 = vpop.f32.mrb[1].mxu1 }
  0xf9   : > { %v642_v35 = vand.u32 2147483647, %v2911_v29  ;;  %v645_v36 = vand.u32 2139095040, %v2911_v29  ;;  %v2919_v37 = vpop.f32.mrb[2].mxu0  ;;  %v2935_v55 = vadd.f32 %v530_v34, %v344_v25 }
  0xfa   : > { %v543_v38 = vshrl.u32 %v542_v32, 23  ;;  %v546_v39 = vand.u32 8388607, %v539_v31  ;;  %v748_v42 = vand.u32 2139095040, %v2915_v33  ;;  %v3816_v44 = vand.u32 2147483647, %v2915_v33 }
  0xfb   : > { %v646_v40 = vshrl.u32 %v645_v36, 23  ;;  %v649_v41 = vand.u32 8388607, %v642_v35  ;;  %v2927_v48 = vpop.f32.mrb[3].mxu0  ;;  %v2929_v49 = vpop.f32.mrb[2].mxu1  ;;  %v851_v3 = vand.u32 2139095040, %v2935_v55 }
  0xfc   : > { %v2348_v43 = vadd.s32 4294967169, %v543_v38  ;;  %v547_v45 = vor.u32 8388608, %v546_v39  ;;  %v749_v47 = vshrl.u32 %v748_v42, 23  ;;  %v2933_v54 = vand.u32 8388607, %v3816_v44  ;;  %v2937_v56 = vpop.f32.mrb[3].mxu1 }
  0xfd   : > { %v2352_v46 = vadd.s32 4294967169, %v646_v40  ;;  %v650_v51 = vor.u32 8388608, %v649_v41 }
  0xfe   : > { %v549_v50 = vadd.s32 1, %v2348_v43  ;;  %v2356_v53 = vadd.s32 4294967169, %v749_v47  ;;  %v2939_v58 = vshll.u32 %v547_v45, 8  ;;  %v753_v0 = vor.u32 8388608, %v2933_v54 }
  0xff   : > { %v652_v52 = vadd.s32 1, %v2352_v46  ;;  %v2941_v62 = vshll.u32 %v650_v51, 8 }
 0x100   : > { %vm550_vm2 = vcmp.gt.s32.totalorder %v549_v50, 0  ;;  %v2946_v2 = vadd.s32 1, %v2356_v53 }
 0x101   : > { %v551_v57 = vsel %vm550_vm2, %v549_v50, 0  ;;  %vm653_vm3 = vcmp.gt.s32.totalorder %v652_v52, 0 }
 0x102   : > { %v552_v59 = vshrl.u32 %v551_v57, 5  ;;  %v553_v60 = vand.u32 31, %v551_v57  ;;  %v654_v61 = vsel %vm653_vm3, %v652_v52, 0  ;;  %vm756_vm8 = vcmp.gt.s32.totalorder %v2946_v2, 0 }
 0x103   : > { %v2943_v63 = vand.u32 31, %v654_v61  ;;  %v2954_v17 = vshrl.u32 %v654_v61, 5 }
 0x104   : > { %v554_v5 = vsub.s32 32, %v553_v60  ;;  %v556_v8 = vshll.u32 %v3822_v7, %v553_v60  ;;  %v559_v10 = vshll.u32 %v3820_v9, %v553_v60  ;;  %v562_v12 = vshll.u32 %v3824_v11, %v553_v60 }
 0x105   : > { %v565_v14 = vshll.u32 %v3826_v13, %v553_v60  ;;  %v568_v16 = vshll.u32 %v2759_v15, %v553_v60  ;;  %vm571_vm4 = vcmp.lt.s32.totalorder %v552_v59, 1  ;;  %vm572_vm5 = vcmp.lt.s32.totalorder %v552_v59, 2 }
 0x106   : > { %v555_v18 = vshrl.u32 %v3822_v7, %v554_v5  ;;  %v557_v19 = vshrl.u32 %v3820_v9, %v554_v5  ;;  %v560_v20 = vshrl.u32 %v3824_v11, %v554_v5  ;;  %v563_v21 = vshrl.u32 %v3826_v13, %v554_v5 }
 0x107   : > { %v566_v22 = vshrl.u32 %v2759_v15, %v554_v5  ;;  %v569_v24 = vshrl.u32 %v2760_v23, %v554_v5  ;;  %vm573_vm6 = vcmp.lt.s32.totalorder %v552_v59, 3  ;;  %v657_v30 = vsub.s32 32, %v2943_v63 }
 0x108   : > { %v558_v25 = vor.u32 %v557_v19, %v556_v8  ;;  %v561_v26 = vor.u32 %v560_v20, %v559_v10  ;;  %v564_v28 = vor.u32 %v563_v21, %v562_v12  ;;  %vm574_vm7 = vcmp.lt.s32.totalorder %v552_v59, 4 }
 0x109   : > { %v567_v32 = vor.u32 %v566_v22, %v565_v14  ;;  %v570_v34 = vor.u32 %v569_v24, %v568_v16  ;;  %v659_v36 = vshll.u32 %v3822_v7, %v2943_v63  ;;  %v662_v46 = vshll.u32 %v3820_v9, %v2943_v63 }
 0x10a   : > { %v575_v38 = vsel %vm571_vm4, %v555_v18, %v558_v25  ;;  %v576_v39 = vsel %vm574_vm7, %v564_v28, 2102212464  ;;  %v579_v40 = vsel %vm571_vm4, %v558_v25, %v561_v26  ;;  %v583_v41 = vsel %vm571_vm4, %v561_v26, %v564_v28 }
 0x10b   : > { %v577_v42 = vsel %vm573_vm6, %v561_v26, %v576_v39  ;;  %v580_v43 = vsel %vm574_vm7, %v567_v32, 920167782  ;;  %v584_v45 = vsel %vm574_vm7, %v570_v34, 1326507024  ;;  %v658_v51 = vshrl.u32 %v3822_v7, %v657_v30 }
 0x10c   : > { %v581_v47 = vsel %vm573_vm6, %v564_v28, %v580_v43  ;;  %v585_v50 = vsel %vm573_vm6, %v567_v32, %v584_v45  ;;  %v660_v52 = vshrl.u32 %v3820_v9, %v657_v30  ;;  %v578_v53 = vsel %vm572_vm5, %v575_v38, %v577_v42 }
 0x10d   : > { %v582_v57 = vsel %vm572_vm5, %v579_v40, %v581_v47  ;;  %v586_v60 = vsel %vm572_vm5, %v583_v41, %v585_v50  ;;  %v663_v61 = vshrl.u32 %v3824_v11, %v657_v30  ;;  %v665_v18 = vshll.u32 %v3824_v11, %v2943_v63 }
 0x10e   : > { %v2981_v5 = vmul.u32.u64.low %v2939_v58, %v586_v60  ;;  %v2982_v8 = vmul.u32.u64.high %v2939_v58, %v586_v60, %v2981_v5  ;;  %v2985_v10 = vmul.u32.u64.low %v2939_v58, %v582_v57  ;;  %v2986_v12 = vmul.u32.u64.high %v2939_v58, %v582_v57, %v2985_v10 }
 0x10f   : > { %v661_v14 = vor.u32 %v660_v52, %v659_v36  ;;  %v664_v16 = vor.u32 %v663_v61, %v662_v46  ;;  %v666_v19 = vshrl.u32 %v3826_v13, %v657_v30  ;;  %v594_v59 = vmul.u32 %v2939_v58, %v578_v53 }
 0x110   : > { %v668_v20 = vshll.u32 %v3826_v13, %v2943_v63  ;;  %v669_v21 = vshrl.u32 %v2759_v15, %v657_v30  ;;  %v672_v22 = vshrl.u32 %v2760_v23, %v657_v30  ;;  %v671_v25 = vshll.u32 %v2759_v15, %v2943_v63 }
 0x111   : > { %v667_v24 = vor.u32 %v666_v19, %v665_v18  ;;  %vm674_vm9 = vcmp.lt.s32.totalorder %v2954_v17, 1  ;;  %vm675_vm10 = vcmp.lt.s32.totalorder %v2954_v17, 2  ;;  %vm596_vm11 = vc.u32 %v2982_v8, %v2985_v10 }
 0x112   : > { %v597_v58 = vadd.s32 1, %v2986_v12  ;;  %v670_v26 = vor.u32 %v669_v21, %v668_v20  ;;  %vm676_vm12 = vcmp.lt.s32.totalorder %v2954_v17, 3  ;;  %v673_v28 = vor.u32 %v672_v22, %v671_v25 }
 0x113   : > { %vm677_vm13 = vcmp.lt.s32.totalorder %v2954_v17, 4  ;;  %v678_v30 = vsel %vm674_vm9, %v658_v51, %v661_v14  ;;  %v682_v32 = vsel %vm674_vm9, %v661_v14, %v664_v16  ;;  %v686_v38 = vsel %vm674_vm9, %v664_v16, %v667_v24 }
 0x114   : > { %v598_v34 = vsel %vm596_vm11, %v597_v58, %v2986_v12  ;;  %v679_v63 = vsel %vm677_vm13, %v667_v24, 2102212464  ;;  %v683_v36 = vsel %vm677_vm13, %v670_v26, 920167782  ;;  %v687_v42 = vsel %vm677_vm13, %v673_v28, 1326507024 }
 0x115   : > { %v599_v39 = vadd.s32 %v598_v34, %v594_v59  ;;  %v680_v40 = vsel %vm676_vm12, %v664_v16, %v679_v63  ;;  %v684_v41 = vsel %vm676_vm12, %v667_v24, %v683_v36  ;;  %v688_v45 = vsel %vm676_vm12, %v670_v26, %v687_v42 }
 0x116   : > { %v685_v43 = vsel %vm675_vm10, %v682_v32, %v684_v41  ;;  %v757_v46 = vsel %vm756_vm8, %v2946_v2, 0  ;;  %v852_v47 = vshrl.u32 %v851_v3, 23  ;;  %v689_v51 = vsel %vm675_vm10, %v686_v38, %v688_v45 }
 0x117   : > { %v600_v50 = vadd.s32 536870912, %v599_v39  ;;  %v3017_v52 = vmul.u32.u64.low %v2941_v62, %v685_v43  ;;  %v3018_v53 = vmul.u32.u64.high %v2941_v62, %v685_v43, %v3017_v52  ;;  %v681_v57 = vsel %vm675_vm10, %v678_v30, %v680_v40 }
 0x118   : > { %v3024_v60 = vmul.u32.u64.low %v2941_v62, %v689_v51  ;;  %v3025_v61 = vmul.u32.u64.high %v2941_v62, %v689_v51, %v3024_v60  ;;  %v758_v2 = vshrl.u32 %v757_v46, 5  ;;  %v759_v3 = vand.u32 31, %v757_v46 }
 0x119   : > { %v3027_v5 = vshrl.u32 %v600_v50, 30  ;;  %v3031_v12 = vshll.u32 %v753_v0, 8  ;;  %v697_v16 = vmul.u32 %v2941_v62, %v681_v57  ;;  %v700_v18 = vadd.s32 1, %v3018_v53 }
 0x11a   : > { %v760_v17 = vsub.s32 32, %v759_v3  ;;  %vm699_vm14 = vc.u32 %v3025_v61, %v3017_v52  ;;  %vm777_vm15 = vcmp.lt.s32.totalorder %v758_v2, 1  ;;  %vm779_vm0 = vcmp.lt.s32.totalorder %v758_v2, 3 }
 0x11b   : > { %v602_v14 = vshll.u32 %v3027_v5, 30  ;;  %v2360_v19 = vadd.s32 4294967169, %v852_v47  ;;  %v701_v20 = vsel %vm699_vm14, %v700_v18, %v3018_v53  ;;  %v762_v54 = vshll.u32 %v3822_v7, %v759_v3 }
 0x11c   : > { %v765_v0 = vshll.u32 %v3820_v9, %v759_v3  ;;  %vm778_vm1 = vcmp.lt.s32.totalorder %v758_v2, 2  ;;  %v702_v21 = vadd.s32 %v701_v20, %v697_v16  ;;  %v761_v62 = vshrl.u32 %v3822_v7, %v760_v17 }
 0x11d   : > { %v3038_v59 = vsub.s32 %v599_v39, %v602_v14  ;;  %v763_v22 = vshrl.u32 %v3820_v9, %v760_v17  ;;  %v766_v24 = vshrl.u32 %v3824_v11, %v760_v17  ;;  %v768_v58 = vshll.u32 %v3824_v11, %v759_v3 }
 0x11e   : > { %v769_v26 = vshrl.u32 %v3826_v13, %v760_v17  ;;  %v771_v28 = vshll.u32 %v3826_v13, %v759_v3  ;;  %v703_v30 = vadd.s32 536870912, %v702_v21  ;;  %v772_v63 = vshrl.u32 %v2759_v15, %v760_v17 }
 0x11f   : > { %v605_v25 = vsub.s32 0, %v3038_v59  ;;  %v764_v32 = vor.u32 %v763_v22, %v762_v54  ;;  %v767_v34 = vor.u32 %v766_v24, %v765_v0  ;;  %v774_v39 = vshll.u32 %v2759_v15, %v759_v3 }
 0x120   : > { %v770_v38 = vor.u32 %v769_v26, %v768_v58  ;;  %v775_v40 = vshrl.u32 %v2760_v23, %v760_v17  ;;  %v3054_v41 = vshrl.u32 %v703_v30, 30  ;;  %v773_v42 = vor.u32 %v772_v63, %v771_v28 }
 0x121   : > { %v2349_v36 = vmin.u32 %v605_v25, %v3038_v59  ;;  %vm780_vm2 = vcmp.lt.s32.totalorder %v758_v2, 4  ;;  %v781_v43 = vsel %vm777_vm15, %v761_v62, %v764_v32  ;;  %v785_v50 = vsel %vm777_vm15, %v764_v32, %v767_v34 }
 0x122   : > { %v776_v46 = vor.u32 %v775_v40, %v774_v39  ;;  %v782_v47 = vsel %vm780_vm2, %v770_v38, 2102212464  ;;  %v705_v51 = vshll.u32 %v3054_v41, 30  ;;  %v786_v57 = vsel %vm780_vm2, %v773_v42, 920167782 }
 0x123   : > { %v607_v45 = vclz %v2349_v36  ;;  %v783_v53 = vsel %vm779_vm0, %v767_v34, %v782_v47  ;;  %v789_v60 = vsel %vm777_vm15, %v767_v34, %v770_v38  ;;  %v787_v14 = vsel %vm779_vm0, %v770_v38, %v786_v57  ;;  %v3089_v47 = vpop.permute.xlu0 %348 }
 0x124   : > { %v790_v16 = vsel %vm780_vm2, %v776_v46, 1326507024  ;;  %v858_v18 = vadd.s32 1, %v2360_v19  ;;  %v3062_v17 = vsub.s32 %v702_v21, %v705_v51  ;;  %v784_v20 = vsel %vm778_vm1, %v781_v43, %v783_v53 }
 0x125   : > { %v2350_v3 = vadd.s32 4294967294, %v607_v45  ;;  %v788_v54 = vsel %vm778_vm1, %v785_v50, %v787_v14  ;;  %v791_v0 = vsel %vm779_vm0, %v773_v42, %v790_v16  ;;  %v3815_v28 = vand.u32 2147483647, %v2935_v55 }
 0x126   : > { %v792_v62 = vsel %vm778_vm1, %v789_v60, %v791_v0  ;;  %v3069_v22 = vmul.u32.u64.low %v3031_v12, %v788_v54  ;;  %v3070_v24 = vmul.u32.u64.high %v3031_v12, %v788_v54, %v3069_v22  ;;  %v708_v58 = vsub.s32 0, %v3062_v17 }
 0x127   : > { %vm2351_vm3 = vcmp.lt.s32.totalorder %v2350_v3, 0  ;;  %v3075_v19 = vmul.u32.u64.low %v3031_v12, %v792_v62  ;;  %v3076_v21 = vmul.u32.u64.high %v3031_v12, %v792_v62, %v3075_v19  ;;  %vm859_vm4 = vcmp.gt.s32.totalorder %v858_v18, 0 }
 0x128   : > { %v610_v25 = vsel %vm2351_vm3, 0, %v2350_v3  ;;  %v2353_v30 = vmin.u32 %v708_v58, %v3062_v17  ;;  %v860_v2 = vsel %vm859_vm4, %v858_v18, 0  ;;  %v800_v32 = vmul.u32 %v3031_v12, %v784_v20 }
 0x129   : > { %v615_v26 = vsub.s32 4294967266, %v610_v25  ;;  %v803_v34 = vadd.s32 1, %v3070_v24  ;;  %vm802_vm5 = vc.u32 %v3076_v21, %v3069_v22  ;;  %v862_v38 = vand.u32 31, %v860_v2 }
 0x12a   : > { %v710_v36 = vclz %v2353_v30  ;;  %v611_v39 = vsub.s32 32, %v610_v25  ;;  %v855_v42 = vand.u32 8388607, %v3815_v28  ;;  %v595_v12 = vadd.s32 %v2985_v10, %v2982_v8 }
 0x12b   : > { %v616_v63 = vadd.s32 127, %v615_v26  ;;  %v804_v40 = vsel %vm802_vm5, %v803_v34, %v3070_v24  ;;  %v863_v46 = vsub.s32 32, %v862_v38  ;;  %v3093_v3 = vadd.f32 %v2919_v37, %v3089_v47 }
 0x12c   : > { %v2354_v43 = vadd.s32 4294967294, %v710_v36  ;;  %v805_v45 = vadd.s32 %v804_v40, %v800_v32  ;;  %v613_v53 = vshrl.u32 %v595_v12, %v611_v39  ;;  %v856_v60 = vor.u32 8388608, %v855_v42 }
 0x12d   : > { %v617_v50 = vshll.u32 %v616_v63, 23  ;;  %v866_v18 = vshrl.u32 %v3820_v9, %v863_v46  ;;  %v869_v20 = vshrl.u32 %v3824_v11, %v863_v46  ;;  %v612_v8 = vshll.u32 %v3038_v59, %v610_v25 }
 0x12e   : > { %vm2355_vm6 = vcmp.lt.s32.totalorder %v2354_v43, 0  ;;  %v806_v51 = vadd.s32 536870912, %v805_v45  ;;  %v861_v10 = vshrl.u32 %v860_v2, 5  ;;  %v865_v54 = vshll.u32 %v3822_v7, %v862_v38 }
 0x12f   : > { %v713_v57 = vsel %vm2355_vm6, 0, %v2354_v43  ;;  %v872_v0 = vshrl.u32 %v3826_v13, %v863_v46  ;;  %v618_v62 = vor.u32 4788187, %v617_v50  ;;  %v868_v37 = vshll.u32 %v3820_v9, %v862_v38 }
 0x130   : > { %v718_v14 = vsub.s32 4294967266, %v713_v57  ;;  %v3095_v16 = vshrl.u32 %v806_v51, 30  ;;  %v614_v19 = vor.u32 %v613_v53, %v612_v8  ;;  %v871_v26 = vshll.u32 %v3824_v11, %v862_v38 }
 0x131   : > { %v874_v30 = vshll.u32 %v3826_v13, %v862_v38  ;;  %v875_v32 = vshrl.u32 %v2759_v15, %v863_v46  ;;  %v714_v34 = vsub.s32 32, %v713_v57  ;;  %v867_v25 = vor.u32 %v866_v18, %v865_v54 }
 0x132   : > { %v719_v24 = vadd.s32 127, %v718_v14  ;;  %v808_v58 = vshll.u32 %v3095_v16, 30  ;;  %v870_v2 = vor.u32 %v869_v20, %v868_v37  ;;  %v873_v63 = vor.u32 %v872_v0, %v871_v26 }
 0x133   : > { %v876_v36 = vor.u32 %v875_v32, %v874_v30  ;;  %v877_v39 = vshll.u32 %v2759_v15, %v862_v38  ;;  %v878_v40 = vshrl.u32 %v2760_v23, %v863_v46  ;;  %v619_v42 = vand.u32 2147483647, %v618_v62 }
 0x134   : > { %v3107_v59 = vsub.s32 %v805_v45, %v808_v58  ;;  %v698_v43 = vadd.s32 %v3017_v52, %v3025_v61  ;;  %v720_v12 = vshll.u32 %v719_v24, 23  ;;  %v896_v50 = vshll.u32 %v856_v60, 8 }
 0x135   : > { %v621_v51 = vcvt.s32.f32 %v614_v19  ;;  %v879_v14 = vor.u32 %v878_v40, %v877_v39  ;;  %vm880_vm7 = vcmp.lt.s32.totalorder %v861_v10, 1  ;;  %v715_v45 = vshll.u32 %v3062_v17, %v713_v57 }
 0x136   : > { %v811_v53 = vsub.s32 0, %v3107_v59  ;;  %v716_v18 = vshrl.u32 %v698_v43, %v714_v34  ;;  %v864_v20 = vshrl.u32 %v3822_v7, %v863_v46  ;;  %vm883_vm8 = vcmp.lt.s32.totalorder %v861_v10, 4 }
 0x137   : > { %vm882_vm9 = vcmp.lt.s32.totalorder %v861_v10, 3  ;;  %v885_v38 = vsel %vm883_vm8, %v873_v63, 2102212464  ;;  %v888_v8 = vsel %vm880_vm7, %v867_v25, %v870_v2  ;;  %v889_v54 = vsel %vm883_vm8, %v876_v36, 920167782 }
 0x138   : > { %v622_v0 = vmul.f32 %v621_v51, %v619_v42  ;;  %v721_v52 = vor.u32 4788187, %v720_v12  ;;  %vm881_vm10 = vcmp.lt.s32.totalorder %v861_v10, 2  ;;  %v890_v61 = vsel %vm882_vm9, %v873_v63, %v889_v54 }
 0x139   : > { %v2357_v60 = vmin.u32 %v811_v53, %v3107_v59  ;;  %v891_v62 = vsel %vm881_vm10, %v888_v8, %v890_v61  ;;  %v892_v24 = vsel %vm880_vm7, %v870_v2, %v873_v63  ;;  %v893_v17 = vsel %vm883_vm8, %v879_v14, 1326507024 }
 0x13a   : > { %v717_v57 = vor.u32 %v716_v18, %v715_v45  ;;  %v884_v46 = vsel %vm880_vm7, %v864_v20, %v867_v25  ;;  %v886_v58 = vsel %vm882_vm9, %v870_v2, %v885_v38  ;;  %v894_v37 = vsel %vm882_vm9, %v876_v36, %v893_v17 }
 0x13b   : > { %v895_v19 = vsel %vm881_vm10, %v892_v24, %v894_v37  ;;  %v3122_v26 = vmul.u32.u64.low %v896_v50, %v891_v62  ;;  %v3123_v30 = vmul.u32.u64.high %v896_v50, %v891_v62, %v3122_v26  ;;  %v623_v32 = vxor.u32 2147483648, %v622_v0 }
 0x13c   : > { %v722_v34 = vand.u32 2147483647, %v721_v52  ;;  %v3126_v39 = vmul.u32.u64.low %v896_v50, %v895_v19  ;;  %v3127_v40 = vmul.u32.u64.high %v896_v50, %v895_v19, %v3126_v39  ;;  %v813_v42 = vclz %v2357_v60 }
 0x13d   : > { %v887_v63 = vsel %vm881_vm10, %v884_v46, %v886_v58  ;;  %v954_v43 = vand.u32 2139095040, %v3093_v3  ;;  %vm541_vm11 = vcmp.lt.s32.totalorder %v2909_v27, 0  ;;  %v724_v25 = vcvt.s32.f32 %v717_v57 }
 0x13e   : > { %v625_v2 = vsub.s32 4, %v3027_v5  ;;  %v906_v36 = vadd.s32 1, %v3123_v30  ;;  %v951_v12 = vand.u32 2147483647, %v3093_v3  ;;  %v624_v53 = vsel %vm541_vm11, %v623_v32, %v622_v0 }
 0x13f   : > { %v955_v51 = vshrl.u32 %v954_v43, 23  ;;  %v725_v14 = vmul.f32 %v724_v25, %v722_v34  ;;  %v903_v45 = vmul.u32 %v896_v50, %v887_v63  ;;  %vm905_vm12 = vc.u32 %v3127_v40, %v3122_v26 }
 0x140   : > { %v2358_v10 = vadd.s32 4294967294, %v813_v42  ;;  %v907_v18 = vsel %vm905_vm12, %v906_v36, %v3123_v30  ;;  %v3142_v38 = vadd.f32 %v2927_v48, %v3089_v47  ;;  %vm3146_vm13 = vcmp.le.f32.partialorder %v539_v31, 0.7853982 }
 0x141   : > { %v2364_v20 = vadd.s32 4294967169, %v955_v51  ;;  %v908_v8 = vadd.s32 %v907_v18, %v903_v45  ;;  %v3153_v50 = vsel %vm541_vm11, %v625_v2, %v3027_v5  ;;  %v3158_v52 = vsel %vm3146_vm13, %v2909_v27, %v624_v53 }
 0x142   : > { %v726_v48 = vxor.u32 2147483648, %v725_v14  ;;  %vm2359_vm14 = vcmp.lt.s32.totalorder %v2358_v10, 0  ;;  %v958_v31 = vand.u32 8388607, %v951_v12  ;;  %v1057_v60 = vand.u32 2139095040, %v3142_v38 }
 0x143   : > { %v961_v0 = vadd.s32 1, %v2364_v20  ;;  %v909_v61 = vadd.s32 536870912, %v908_v8  ;;  %vm3170_vm0 = vcmp.le.f32.partialorder %v642_v35, 0.7853982  ;;  %vm644_vm1 = vcmp.lt.s32.totalorder %v2911_v29, 0 }
 0x144   : > { %2560 = vcosq.f32 %v3158_v52  ;;  %v727_v46 = vsel %vm644_vm1, %v726_v48, %v725_v14  ;;  %v3178_v58 = vsel %vm2359_vm14, 0, %v2358_v10  ;;  %v959_v19 = vor.u32 8388608, %v958_v31 }
 0x145   : > { %vm962_vm15 = vcmp.gt.s32.totalorder %v961_v0, 0  ;;  %v3163_v62 = vshrl.u32 %v909_v61, 30  ;;  %v1058_v34 = vshrl.u32 %v1057_v60, 23  ;;  %v730_v10 = vsel %vm3170_vm0, %v2911_v29, %v727_v46 }
 0x146   : > { %v963_v24 = vsel %vm962_vm15, %v961_v0, 0  ;;  %v817_v0 = vsub.s32 32, %v3178_v58  ;;  %v821_v60 = vsub.s32 4294967266, %v3178_v58  ;;  %2562 = vsinq.f32 %v3158_v52 }
 0x147   : > { %v965_v57 = vand.u32 31, %v963_v24  ;;  %v911_v37 = vshll.u32 %v3163_v62, 30  ;;  %v964_v30 = vshrl.u32 %v963_v24, 5  ;;  %v999_v24 = vshll.u32 %v959_v19, 8 }
 0x148   : > { %v822_v4 = vadd.s32 127, %v821_v60  ;;  %2564 = vcosq.f32 %v730_v10  ;;  %v818_v60 = vshll.u32 %v3107_v59, %v3178_v58  ;;  %v3238_v59 = vadd.f32 %v2929_v49, %v3089_v47 }
 0x149   : > { %v966_v32 = vsub.s32 32, %v965_v57  ;;  %v3181_v35 = vsub.s32 %v908_v8, %v911_v37  ;;  %v968_v39 = vshll.u32 %v3822_v7, %v965_v57  ;;  %v971_v42 = vshll.u32 %v3820_v9, %v965_v57 }
 0x14a   : > { %v974_v63 = vshll.u32 %v3824_v11, %v965_v57  ;;  %v977_v36 = vshll.u32 %v3826_v13, %v965_v57  ;;  %v980_v14 = vshll.u32 %v2759_v15, %v965_v57  ;;  %vm983_vm2 = vcmp.lt.s32.totalorder %v964_v30, 1 }
 0x14b   : > { %v969_v43 = vshrl.u32 %v3820_v9, %v966_v32  ;;  %v972_v25 = vshrl.u32 %v3824_v11, %v966_v32  ;;  %v975_v2 = vshrl.u32 %v3826_v13, %v966_v32  ;;  %v914_v51 = vsub.s32 0, %v3181_v35 }
 0x14c   : > { %v978_v53 = vshrl.u32 %v2759_v15, %v966_v32  ;;  %v981_v45 = vshrl.u32 %v2760_v23, %v966_v32  ;;  %v2368_v57 = vadd.s32 4294967169, %v1058_v34  ;;  %vm985_vm3 = vcmp.lt.s32.totalorder %v964_v30, 3 }
 0x14d   : > { %v970_v18 = vor.u32 %v969_v43, %v968_v39  ;;  %v973_v20 = vor.u32 %v972_v25, %v971_v42  ;;  %v976_v8 = vor.u32 %v975_v2, %v974_v63  ;;  %v2361_v48 = vmin.u32 %v914_v51, %v3181_v35 }
 0x14e   : > { %v979_v61 = vor.u32 %v978_v53, %v977_v36  ;;  %v982_v31 = vor.u32 %v981_v45, %v980_v14  ;;  %vm986_vm4 = vcmp.lt.s32.totalorder %v964_v30, 4  ;;  %v3202_v43 = vpop.eup %2560  ;;  %v967_v25 = vshrl.u32 %v3822_v7, %v966_v32 }
 0x14f   : > { %v916_v37 = vclz %v2361_v48  ;;  %v991_v1 = vsel %vm983_vm2, %v970_v18, %v973_v20  ;;  %v988_v46 = vsel %vm986_vm4, %v976_v8, 2102212464  ;;  %v995_v42 = vsel %vm983_vm2, %v973_v20, %v976_v8 }
 0x150   : > { %v992_v39 = vsel %vm986_vm4, %v979_v61, 920167782  ;;  %v996_v63 = vsel %vm986_vm4, %v982_v31, 1326507024  ;;  %vm984_vm5 = vcmp.lt.s32.totalorder %v964_v30, 2  ;;  %v1064_v53 = vadd.s32 1, %v2368_v57 }
 0x151   : > { %v993_v2 = vsel %vm985_vm3, %v976_v8, %v992_v39  ;;  %v997_v19 = vsel %vm985_vm3, %v979_v61, %v996_v63  ;;  %v2362_v34 = vadd.s32 4294967294, %v916_v37  ;;  %v987_v14 = vsel %vm983_vm2, %v967_v25, %v970_v18 }
 0x152   : > { %v994_v36 = vsel %vm984_vm5, %v991_v1, %v993_v2  ;;  %v998_v51 = vsel %vm984_vm5, %v995_v42, %v997_v19  ;;  %v989_v45 = vsel %vm985_vm3, %v973_v20, %v988_v46  ;;  %vm1065_vm6 = vcmp.gt.s32.totalorder %v1064_v53, 0 }
 0x153   : > { %v3211_v48 = vmul.u32.u64.low %v999_v24, %v998_v51  ;;  %v3212_v31 = vmul.u32.u64.high %v999_v24, %v998_v51, %v3211_v48  ;;  %v3214_v32 = vmul.u32.u64.low %v999_v24, %v994_v36  ;;  %v3215_v28 = vmul.u32.u64.high %v999_v24, %v994_v36, %v3214_v32 }
 0x154   : > { %v801_v1 = vadd.s32 %v3069_v22, %v3076_v21  ;;  %v3819_v8 = vand.u32 2147483647, %v3142_v38  ;;  %v1066_v61 = vsel %vm1065_vm6, %v1064_v53, 0  ;;  %vm2363_vm7 = vcmp.lt.s32.totalorder %v2362_v34, 0  ;;  %v3257_v48 = vpop.eup %2562 }
 0x155   : > { %v990_v18 = vsel %vm984_vm5, %v987_v14, %v989_v45  ;;  %v1068_v20 = vand.u32 31, %v1066_v61  ;;  %2566 = vsinq.f32 %v730_v10  ;;  %vm1008_vm8 = vc.u32 %v3212_v31, %v3214_v32 }
 0x156   : > { %v819_v57 = vshrl.u32 %v801_v1, %v817_v0  ;;  %v823_v52 = vshll.u32 %v822_v4, 23  ;;  %v3229_v22 = vadd.s32 %v3122_v26, %v3127_v40  ;;  %v1009_v21 = vadd.s32 1, %v3215_v28 }
 0x157   : > { %v1069_v37 = vsub.s32 32, %v1068_v20  ;;  %v3232_v46 = vsel %vm2363_vm7, 0, %v2362_v34  ;;  %v1006_v30 = vmul.u32 %v999_v24, %v990_v18  ;;  %v1061_v10 = vand.u32 8388607, %v3819_v8 }
 0x158   : > { %v1010_v58 = vsel %vm1008_vm8, %v1009_v21, %v3215_v28  ;;  %v1071_v4 = vshll.u32 %v3822_v7, %v1068_v20  ;;  %v3244_v39 = vshrl.u32 %v1066_v61, 5  ;;  %v1074_v24 = vshll.u32 %v3820_v9, %v1068_v20  ;;  %v3262_v21 = vpop.eup %2564 }
 0x159   : > { %v1072_v26 = vshrl.u32 %v3820_v9, %v1069_v37  ;;  %v1075_v40 = vshrl.u32 %v3824_v11, %v1069_v37  ;;  %v1011_v0 = vadd.s32 %v1010_v58, %v1006_v30  ;;  %v1078_v42 = vshrl.u32 %v3826_v13, %v1069_v37 }
 0x15a   : > { %v1077_v25 = vshll.u32 %v3824_v11, %v1068_v20  ;;  %v1080_v49 = vshll.u32 %v3826_v13, %v1068_v20  ;;  %v1081_v28 = vshrl.u32 %v2759_v15, %v1069_v37  ;;  %v1083_v34 = vshll.u32 %v2759_v15, %v1068_v20 }
 0x15b   : > { %v1073_v63 = vor.u32 %v1072_v26, %v1071_v4  ;;  %v1012_v2 = vadd.s32 536870912, %v1011_v0  ;;  %v1076_v19 = vor.u32 %v1075_v40, %v1074_v24  ;;  %v1084_v36 = vshrl.u32 %v2760_v23, %v1069_v37  ;;  %v1367_v4 = vld [vmem:[%s3806_s4] sm:$0xff] }
 0x15c   : > { %v3253_v51 = vor.u32 %v819_v57, %v818_v60  ;;  %v3255_v53 = vor.u32 4788187, %v823_v52  ;;  %v1079_v14 = vor.u32 %v1078_v42, %v1077_v25  ;;  %v1082_v45 = vor.u32 %v1081_v28, %v1080_v49  ;;  %1373 = vperm.xlu1 %2558, %v1367_v4  }
 0x15d   : > { %v3259_v1 = vshrl.u32 %v1012_v2, 30  ;;  %v1062_v61 = vor.u32 8388608, %v1061_v10  ;;  %v1085_v18 = vor.u32 %v1084_v36, %v1083_v34  ;;  %vm1089_vm9 = vcmp.lt.s32.totalorder %v3244_v39, 4  ;;  %v1368_v2 = vld [vmem:[%s3806_s4 + $0x8] sm:$0xff] }
 0x15e   : > { %v924_v20 = vsub.s32 4294967266, %v3232_v46  ;;  %vm1086_vm10 = vcmp.lt.s32.totalorder %v3244_v39, 1  ;;  %v1095_v60 = vsel %vm1089_vm9, %v1082_v45, 920167782  ;;  %v3817_v57 = vand.u32 2147483647, %v3238_v59 }
 0x15f   : > { %v3269_v52 = vpop.eup %2566  ;;  %v1014_v30 = vshll.u32 %v3259_v1, 30  ;;  %vm1088_vm11 = vcmp.lt.s32.totalorder %v3244_v39, 3  ;;  %v1094_v10 = vsel %vm1086_vm10, %v1073_v63, %v1076_v19  ;;  %v1160_v58 = vand.u32 2139095040, %v3238_v59 }
 0x160   : > { %v920_v26 = vsub.s32 32, %v3232_v46  ;;  %v1096_v40 = vsel %vm1088_vm11, %v1079_v14, %v1095_v60  ;;  %v1098_v24 = vsel %vm1086_vm10, %v1076_v19, %v1079_v14  ;;  %v1099_v42 = vsel %vm1089_vm9, %v1085_v18, 1326507024  ;;  %1378 = vperm.xlu1 %2558, %v1368_v2  }
 0x161   : > { %v3286_v25 = vsub.s32 %v1011_v0, %v1014_v30  ;;  %v1070_v49 = vshrl.u32 %v3822_v7, %v1069_v37  ;;  %vm1087_vm12 = vcmp.lt.s32.totalorder %v3244_v39, 2  ;;  %v1091_v28 = vsel %vm1089_vm9, %v1079_v14, 2102212464 }
 0x162   : > { %v3295_v34 = vadd.s32 127, %v924_v20  ;;  %v1097_v36 = vsel %vm1087_vm12, %v1094_v10, %v1096_v40  ;;  %v1100_v0 = vsel %vm1088_vm11, %v1082_v45, %v1099_v42  ;;  %v1102_v18 = vshll.u32 %v1062_v61, 8 }
 0x163   : > { %v1017_v37 = vsub.s32 0, %v3286_v25  ;;  %v1090_v60 = vsel %vm1086_vm10, %v1070_v49, %v1073_v63  ;;  %v1101_v14 = vsel %vm1087_vm12, %v1098_v24, %v1100_v0  ;;  %v1161_v30 = vshrl.u32 %v1160_v58, 23  ;;  %v1370_v58 = vld [vmem:[%s3806_s4 + $0x18] sm:$0xff] }
 0x164   : > { %v1092_v20 = vsel %vm1088_vm11, %v1076_v19, %v1091_v28  ;;  %v3308_v4 = vmul.u32.u64.low %v1102_v18, %v1101_v14  ;;  %v3309_v44 = vmul.u32.u64.high %v1102_v18, %v1101_v14, %v3308_v4  ;;  %v1164_v10 = vand.u32 8388607, %v3817_v57  ;;  %1388 = vperm.xlu1 %2558, %v1370_v58  }
 0x165   : > { %v2365_v45 = vmin.u32 %v1017_v37, %v3286_v25  ;;  %v3314_v61 = vmul.u32.u64.low %v1102_v18, %v1097_v36  ;;  %v3315_v40 = vmul.u32.u64.high %v1102_v18, %v1097_v36, %v3314_v61  ;;  %v2372_v63 = vadd.s32 4294967169, %v1161_v30 }
 0x166   : > { %v921_v42 = vshll.u32 %v3181_v35, %v3232_v46  ;;  %v3327_v49 = vadd.f32 %v2937_v56, %v3089_v47  ;;  %v1093_v2 = vsel %vm1087_vm12, %v1090_v60, %v1092_v20  ;;  %v1165_v36 = vor.u32 8388608, %v1164_v10 }
 0x167   : > { %v1019_v28 = vclz %v2365_v45  ;;  %v1167_v0 = vadd.s32 1, %v2372_v63  ;;  %v3332_v37 = vshrl.u32 %v3229_v22, %v920_v26  ;;  %v1007_v14 = vadd.s32 %v3214_v32, %v3212_v31  ;;  %v1603_v22 = vld [vmem:[%s3808_s6 + $0x8] sm:$0xff] }
 0x168   : > { %vm1111_vm14 = vc.u32 %v3309_v44, %v3314_v61  ;;  %v3818_v30 = vand.u32 2147483647, %v3327_v49  ;;  %v926_v56 = vshll.u32 %v3295_v34, 23  ;;  %v1112_v39 = vadd.s32 1, %v3315_v40  ;;  %1613 = vperm.xlu1 %2558, %v1603_v22  }
 0x169   : > { %v2366_v47 = vadd.s32 4294967294, %v1019_v28  ;;  %vm1168_vm15 = vcmp.gt.s32.totalorder %v1167_v0, 0  ;;  %v1109_v60 = vmul.u32 %v1102_v18, %v1093_v2  ;;  %v1263_v32 = vand.u32 2139095040, %v3327_v49 }
 0x16a   : > { %v1169_v31 = vsel %vm1168_vm15, %v1167_v0, 0  ;;  %v1113_v20 = vsel %vm1111_vm14, %v1112_v39, %v3315_v40  ;;  %v3347_v10 = vshll.u32 %v1165_v36, 8  ;;  %v3353_v28 = vand.u32 8388607, %v3818_v30  ;;  %v1605_v40 = vld [vmem:[%s3808_s6 + $0x18] sm:$0xff] }
 0x16b   : > { %vm2367_vm2 = vcmp.lt.s32.totalorder %v2366_v47, 0  ;;  %v1171_v4 = vand.u32 31, %v1169_v31  ;;  %v1114_v63 = vadd.s32 %v1113_v20, %v1109_v60  ;;  %v3349_v58 = vshrl.u32 %v1169_v31, 5 }
 0x16c   : > { %v1022_v45 = vsel %vm2367_vm2, 0, %v2366_v47  ;;  %v1264_v0 = vshrl.u32 %v1263_v32, 23  ;;  %1623 = vperm.xlu1 %2558, %v1605_v40   ;;  %vm953_vm3 = vcmp.lt.s32.totalorder %v3093_v3, 0  ;;  %vm3388_vm8 = vcmp.le.f32.partialorder %v951_v12, 0.7853982 }
 0x16d   : > { %v1023_v57 = vsub.s32 32, %v1022_v45  ;;  %v1027_v18 = vsub.s32 4294967266, %v1022_v45  ;;  %v1172_v2 = vsub.s32 32, %v1171_v4  ;;  %v1024_v36 = vshll.u32 %v3286_v25, %v1022_v45 }
 0x16e   : > { %v1115_v39 = vadd.s32 536870912, %v1114_v63  ;;  %v1174_v47 = vshll.u32 %v3822_v7, %v1171_v4  ;;  %v1177_v60 = vshll.u32 %v3820_v9, %v1171_v4  ;;  %v1180_v22 = vshll.u32 %v3824_v11, %v1171_v4 }
 0x16f   : > { %v1025_v31 = vshrl.u32 %v1007_v14, %v1023_v57  ;;  %v1028_v20 = vadd.s32 127, %v1027_v18  ;;  %v1175_v30 = vshrl.u32 %v3820_v9, %v1172_v2  ;;  %v1173_v32 = vshrl.u32 %v3822_v7, %v1172_v2  ;;  %v2401_v14 = vld [vmem:[%s3808_s6 + $0x28] sm:$0xff] }
 0x170   : > { %v3363_v24 = vshrl.u32 %v1115_v39, 30  ;;  %v1178_v19 = vshrl.u32 %v3824_v11, %v1172_v2  ;;  %v1181_v5 = vshrl.u32 %v3826_v13, %v1172_v2  ;;  %v1183_v8 = vshll.u32 %v3826_v13, %v1171_v4  ;;  %1850 = vperm.xlu1 %2558, %v2401_v14  }
 0x171   : > { %v1026_v25 = vor.u32 %v1025_v31, %v1024_v36  ;;  %v1029_v45 = vshll.u32 %v1028_v20, 23  ;;  %v1184_v57 = vshrl.u32 %v2759_v15, %v1172_v2  ;;  %v1176_v39 = vor.u32 %v1175_v30, %v1174_v47 }
 0x172   : > { %v1117_v18 = vshll.u32 %v3363_v24, 30  ;;  %v1179_v9 = vor.u32 %v1178_v19, %v1177_v60  ;;  %v1182_v7 = vor.u32 %v1181_v5, %v1180_v22  ;;  %v1186_v40 = vshll.u32 %v2759_v15, %v1171_v4  ;;  %v2403_v5 = vld [vmem:[%s3808_s6 + $0x38] sm:$0xff] }
 0x173   : > { %v1030_v11 = vor.u32 4788187, %v1029_v45  ;;  %v1185_v26 = vor.u32 %v1184_v57, %v1183_v8  ;;  %v1187_v36 = vshrl.u32 %v2760_v23, %v1172_v2  ;;  %v1033_v31 = vcvt.s32.f32 %v1026_v25 }
 0x174   : > { %v3377_v20 = vsub.s32 %v1114_v63, %v1117_v18  ;;  %vm1189_vm4 = vcmp.lt.s32.totalorder %v3349_v58, 1  ;;  %vm1190_vm5 = vcmp.lt.s32.totalorder %v3349_v58, 2  ;;  %vm1191_vm6 = vcmp.lt.s32.totalorder %v3349_v58, 3  ;;  %1860 = vperm.xlu1 %2558, %v2403_v5  }
 0x175   : > { %v1031_v13 = vand.u32 2147483647, %v1030_v11  ;;  %v1188_v30 = vor.u32 %v1187_v36, %v1186_v40  ;;  %vm1192_vm7 = vcmp.lt.s32.totalorder %v3349_v58, 4  ;;  %v1197_v11 = vsel %vm1189_vm4, %v1176_v39, %v1179_v9 }
 0x176   : > { %v1120_v19 = vsub.s32 0, %v3377_v20  ;;  %v1194_v4 = vsel %vm1192_vm7, %v1182_v7, 2102212464  ;;  %v1198_v63 = vsel %vm1192_vm7, %v1185_v26, 920167782  ;;  %v1193_v47 = vsel %vm1189_vm4, %v1173_v32, %v1176_v39 }
 0x177   : > { %v1034_v2 = vmul.f32 %v1033_v31, %v1031_v13  ;;  %v1199_v60 = vsel %vm1191_vm6, %v1182_v7, %v1198_v63  ;;  %v1201_v12 = vsel %vm1189_vm4, %v1179_v9, %v1182_v7  ;;  %v1195_v25 = vsel %vm1191_vm6, %v1179_v9, %v1194_v4 }
 0x178   : > { %v2369_v22 = vmin.u32 %v1120_v19, %v3377_v20  ;;  %v1200_v45 = vsel %vm1190_vm5, %v1197_v11, %v1199_v60  ;;  %v1202_v57 = vsel %vm1192_vm7, %v1188_v30, 1326507024  ;;  %v3417_v7 = vor.u32 %v3332_v37, %v921_v42 }
 0x179   : > { %v1035_v13 = vxor.u32 2147483648, %v1034_v2  ;;  %v1203_v32 = vsel %vm1191_vm6, %v1185_v26, %v1202_v57  ;;  %v3409_v14 = vmul.u32.u64.low %v3347_v10, %v1200_v45  ;;  %v3410_v18 = vmul.u32.u64.high %v3347_v10, %v1200_v45, %v3409_v14 }
 0x17a   : > { %v1122_v9 = vclz %v2369_v22  ;;  %v1204_v39 = vsel %vm1190_vm5, %v1201_v12, %v1203_v32  ;;  %v2376_v40 = vadd.s32 4294967169, %v1264_v0  ;;  %v3423_v36 = vor.u32 4788187, %v926_v56 }
 0x17b   : > { %v1196_v26 = vsel %vm1190_vm5, %v1193_v47, %v1195_v25  ;;  %v3428_v31 = vmul.u32.u64.low %v3347_v10, %v1204_v39  ;;  %v3429_v30 = vmul.u32.u64.high %v3347_v10, %v1204_v39, %v3428_v31  ;;  %v1036_v35 = vsel %vm953_vm3, %v1035_v13, %v1034_v2 }
 0x17c   : > { %v2370_v46 = vadd.s32 4294967294, %v1122_v9  ;;  %v1270_v42 = vadd.s32 1, %v2376_v40  ;;  %v728_v37 = vsub.s32 4, %v3054_v41  ;;  %v3836_v0 = vsub.s32 4, %v3259_v1 }
 0x17d   : > { %v1215_v56 = vadd.s32 1, %v3410_v18  ;;  %v1268_v58 = vor.u32 8388608, %v3353_v28  ;;  %v738_v5 = vxor.u32 2147483648, %v3269_v52  ;;  %v1110_v19 = vadd.s32 %v3314_v61, %v3309_v44 }
 0x17e   : > { %v3439_v34 = vsel %vm953_vm3, %v3836_v0, %v3259_v1  ;;  %vm2371_vm9 = vcmp.lt.s32.totalorder %v2370_v46, 0  ;;  %v1212_v4 = vmul.u32 %v3347_v10, %v1196_v26  ;;  %vm1271_vm10 = vcmp.gt.s32.totalorder %v1270_v42, 0 }
 0x17f   : > { %v1039_v11 = vsel %vm3388_vm8, %v3093_v3, %v1036_v35  ;;  %v1125_v63 = vsel %vm2371_vm9, 0, %v2370_v46  ;;  %vm1214_vm11 = vc.u32 %v3429_v30, %v3409_v14  ;;  %v1272_v1 = vsel %vm1271_vm10, %v1270_v42, 0 }
 0x180   : > { %v1126_v2 = vsub.s32 32, %v1125_v63  ;;  %v1130_v28 = vsub.s32 4294967266, %v1125_v63  ;;  %v1216_v47 = vsel %vm1214_vm11, %v1215_v56, %v3410_v18  ;;  %v729_v44 = vsel %vm644_vm1, %v728_v37, %v3054_v41 }
 0x181   : > { %v1217_v61 = vadd.s32 %v1216_v47, %v1212_v4  ;;  %v1274_v10 = vand.u32 31, %v1272_v1  ;;  %v3456_v60 = vshll.u32 %v1268_v58, 8  ;;  %v741_v12 = vxor.u32 2147483648, %v3262_v21 }
 0x182   : > { %2568 = vcosq.f32 %v1039_v11  ;;  %v1127_v22 = vshll.u32 %v3377_v20, %v1125_v63  ;;  %v1128_v25 = vshrl.u32 %v1110_v19, %v1126_v2  ;;  %v1131_v45 = vadd.s32 127, %v1130_v28 }
 0x183   : > { %v1218_v57 = vadd.s32 536870912, %v1217_v61  ;;  %v1273_v13 = vshrl.u32 %v1272_v1, 5  ;;  %v1275_v32 = vsub.s32 32, %v1274_v10  ;;  %v731_v18 = vsel %vm3170_vm0, 0, %v729_v44 }
 0x184   : > { %v1129_v9 = vor.u32 %v1128_v25, %v1127_v22  ;;  %v1132_v39 = vshll.u32 %v1131_v45, 23  ;;  %v3837_v41 = vmov 683565275   ;;  %v3838_v26 = vmov 2475754826  }
 0x185   : > { %v1277_v40 = vshll.u32 %v3837_v41, %v1274_v10  ;;  %v1280_v31 = vshll.u32 %v3838_v26, %v1274_v10  ;;  %vm1056_vm1 = vcmp.lt.s32.totalorder %v3142_v38, 0  ;;  %v3465_v35 = vshrl.u32 %v1218_v57, 30 }
 0x186   : > { %v1278_v20 = vshrl.u32 %v3838_v26, %v1275_v32  ;;  %v3839_v46 = vmov 2131351028   ;;  %v3840_v0 = vand.u32 2147483647, %v3142_v38  ;;  %v1133_v56 = vor.u32 4788187, %v1132_v39 }
 0x187   : > { %v1281_v42 = vshrl.u32 %v3839_v46, %v1275_v32  ;;  %v1283_v37 = vshll.u32 %v3839_v46, %v1274_v10  ;;  %v3843_v58 = vmov 2102212464   ;;  %v1287_v63 = vshrl.u32 %v2759_v15, %v1275_v32 }
 0x188   : > { %vm3472_vm12 = vcmp.le.f32.partialorder %v3840_v0, 0.7853982  ;;  %v1284_v19 = vshrl.u32 %v3843_v58, %v1275_v32  ;;  %v1286_v4 = vshll.u32 %v3843_v58, %v1274_v10  ;;  %v1136_v1 = vcvt.s32.f32 %v1129_v9 }
 0x189   : > { %v1220_v2 = vshll.u32 %v3465_v35, 30  ;;  %v1279_v28 = vor.u32 %v1278_v20, %v1277_v40  ;;  %v1140_v47 = vsub.s32 4, %v3363_v24  ;;  %v1134_v44 = vand.u32 2147483647, %v1133_v56 }
 0x18a   : > { %v1282_v22 = vor.u32 %v1281_v42, %v1280_v31  ;;  %v1285_v25 = vor.u32 %v1284_v19, %v1283_v37  ;;  %v1288_v45 = vor.u32 %v1287_v63, %v1286_v4  ;;  %2570 = vsinq.f32 %v1039_v11 }
 0x18b   : > { %v3481_v57 = vsub.s32 %v1217_v61, %v1220_v2  ;;  %v1289_v39 = vshll.u32 %v2759_v15, %v1274_v10  ;;  %v1290_v26 = vshrl.u32 %v2760_v23, %v1275_v32  ;;  %v1137_v46 = vmul.f32 %v1136_v1, %v1134_v44 }
 0x18c   : > { %v1276_v0 = vshrl.u32 %v3837_v41, %v1275_v32  ;;  %vm1292_vm0 = vcmp.lt.s32.totalorder %v1273_v13, 1  ;;  %v735_v9 = vand.u32 3, %v731_v18  ;;  %vm1294_vm14 = vcmp.lt.s32.totalorder %v1273_v13, 3  ;;  %v3487_v31 = vpop.eup %2568 }
 0x18d   : > { %v1223_v40 = vsub.s32 0, %v3481_v57  ;;  %v1291_v20 = vor.u32 %v1290_v26, %v1289_v39  ;;  %vm1295_vm15 = vcmp.lt.s32.totalorder %v1273_v13, 4  ;;  %v1138_v42 = vxor.u32 2147483648, %v1137_v46 }
 0x18e   : > { %v1297_v11 = vsel %vm1295_vm15, %v1285_v25, 2102212464  ;;  %v1300_v61 = vsel %vm1292_vm0, %v1279_v28, %v1282_v22  ;;  %v1301_v37 = vsel %vm1295_vm15, %v1288_v45, 920167782  ;;  %vm1293_vm2 = vcmp.lt.s32.totalorder %v1273_v13, 2 }
 0x18f   : > { %v2373_v15 = vmin.u32 %v1223_v40, %v3481_v57  ;;  %v1302_v23 = vsel %vm1294_vm14, %v1285_v25, %v1301_v37  ;;  %v1304_v10 = vsel %vm1292_vm0, %v1282_v22, %v1285_v25  ;;  %v1139_v32 = vsel %vm1056_vm1, %v1138_v42, %v1137_v46 }
 0x190   : > { %v1296_v18 = vsel %vm1292_vm0, %v1276_v0, %v1279_v28  ;;  %v1303_v41 = vsel %vm1293_vm2, %v1300_v61, %v1302_v23  ;;  %v1305_v56 = vsel %vm1295_vm15, %v1291_v20, 1326507024  ;;  %v1142_v58 = vsel %vm3472_vm12, %v3142_v38, %v1139_v32 }
 0x191   : > { %v1225_v19 = vclz %v2373_v15  ;;  %v1298_v4 = vsel %vm1294_vm14, %v1282_v22, %v1297_v11  ;;  %v1306_v63 = vsel %vm1294_vm14, %v1288_v45, %v1305_v56  ;;  %2572 = vcosq.f32 %v1142_v58 }
 0x192   : > { %v1307_v1 = vsel %vm1293_vm2, %v1304_v10, %v1306_v63  ;;  %v3504_v2 = vmul.u32.u64.low %v3456_v60, %v1303_v41  ;;  %v3505_v44 = vmul.u32.u64.high %v3456_v60, %v1303_v41, %v3504_v2  ;;  %2574 = vsinq.f32 %v1142_v58 }
 0x193   : > { %v2374_v28 = vadd.s32 4294967294, %v1225_v19  ;;  %v3509_v25 = vmul.u32.u64.low %v3456_v60, %v1307_v1  ;;  %v3510_v39 = vmul.u32.u64.high %v3456_v60, %v1307_v1, %v3509_v25  ;;  %v1299_v26 = vsel %vm1293_vm2, %v1296_v18, %v1298_v4 }
 0x194   : > { %vm737_vm3 = vcmp.eq.s32.totalorder %v735_v9, 0  ;;  %vm740_vm4 = vcmp.eq.s32.totalorder %v735_v9, 2  ;;  %v1141_v22 = vsel %vm1056_vm1, %v1140_v47, %v3363_v24  ;;  %v3516_v45 = vpop.eup %2570  ;;  %v928_v40 = vand.u32 2147483647, %v3423_v36  ;;  %v3577_v36 = vld [vmem:[%s3805_s3] sm:$0xff] }
 0x195   : > { %vm2375_vm5 = vcmp.lt.s32.totalorder %v2374_v28, 0  ;;  %v739_v46 = vsel %vm737_vm3, %v3262_v21, %v738_v5  ;;  %v742_v0 = vsel %vm740_vm4, %v741_v12, %v3269_v52  ;;  %v1143_v13 = vsel %vm3472_vm12, 0, %v1141_v22 }
 0x196   : > { %v930_v20 = vcvt.s32.f32 %v3417_v7  ;;  %v1228_v42 = vsel %vm2375_vm5, 0, %v2374_v28  ;;  %v1318_v24 = vadd.s32 1, %v3505_v44  ;;  %v1040_v47 = vsel %vm3388_vm8, 0, %v3439_v34 }
 0x197   : > { %v1229_v11 = vsub.s32 32, %v1228_v42  ;;  %v1233_v5 = vsub.s32 4294967266, %v1228_v42  ;;  %vm736_vm6 = vcmp.lt.s32.totalorder %v735_v9, 2  ;;  %v1315_v21 = vmul.u32 %v3456_v60, %v1299_v26 }
 0x198   : > { %vm1317_vm7 = vc.u32 %v3510_v39, %v3504_v2  ;;  %v743_v52 = vsel %vm736_vm6, %v739_v46, %v742_v0  ;;  %v1147_v12 = vand.u32 3, %v1143_v13  ;;  %v1213_v17 = vadd.s32 %v3409_v14, %v3429_v30 }
 0x199   : > { %v1234_v61 = vadd.s32 127, %v1233_v5  ;;  %v1319_v37 = vsel %vm1317_vm7, %v1318_v24, %v3505_v44  ;;  %v3844_v8 = vsel %vm3146_vm13, 0, %v3153_v50  ;;  %vm734_vm8 = vweird.f32 %v2911_v29 }
 0x19a   : > { %v632_v34 = vand.u32 3, %v3844_v8  ;;  %v1320_v15 = vadd.s32 %v1319_v37, %v1315_v21  ;;  %v635_v60 = vxor.u32 2147483648, %v3257_v48  ;;  %v638_v9 = vxor.u32 2147483648, %v3202_v43 }
 0x19b   : > { %v1231_v23 = vshrl.u32 %v1213_v17, %v1229_v11  ;;  %v1235_v10 = vshll.u32 %v1234_v61, 23  ;;  %v744_v32 = vsel %vm734_vm8, nan, %v743_v52  ;;  %vm1146_vm9 = vweird.f32 %v3142_v38  ;;  %v2573_v14 = vpop.eup %2572 }
 0x19c   : > { %v1230_v30 = vshll.u32 %v3481_v57, %v1228_v42  ;;  %v1321_v18 = vadd.s32 536870912, %v1320_v15  ;;  %vm1148_vm10 = vcmp.lt.s32.totalorder %v1147_v12, 2  ;;  %vm1152_vm11 = vcmp.eq.s32.totalorder %v1147_v12, 2  ;;  %v2575_v54 = vpop.eup %2574 }
 0x19d   : > { %v1153_v50 = vxor.u32 2147483648, %v2573_v14  ;;  %vm634_vm13 = vcmp.eq.s32.totalorder %v632_v34, 0  ;;  %vm637_vm1 = vcmp.eq.s32.totalorder %v632_v34, 2  ;;  %v1044_v29 = vand.u32 3, %v1040_v47 }
 0x19e   : > { %v3547_v41 = vshrl.u32 %v1321_v18, 30  ;;  %v1150_v56 = vxor.u32 2147483648, %v2575_v54  ;;  %v636_v58 = vsel %vm634_vm13, %v3202_v43, %v635_v60  ;;  %v639_v19 = vsel %vm637_vm1, %v638_v9, %v3257_v48 }
 0x19f   : > { %v1232_v4 = vor.u32 %v1231_v23, %v1230_v30  ;;  %v1236_v63 = vor.u32 4788187, %v1235_v10  ;;  %vm1149_vm12 = vcmp.eq.s32.totalorder %v1147_v12, 0  ;;  %v1154_v1 = vsel %vm1152_vm11, %v1153_v50, %v2575_v54 }
 0x1a0   : > { %v1323_v57 = vshll.u32 %v3547_v41, 30  ;;  %v1151_v44 = vsel %vm1149_vm12, %v2573_v14, %v1150_v56  ;;  %vm633_vm0 = vcmp.lt.s32.totalorder %v632_v34, 2  ;;  %v1047_v28 = vxor.u32 2147483648, %v3516_v45  ;;  %v3615_v56 = vld [vmem:[%s3805_s3 + $0x8] sm:$0xff] }
 0x1a1   : > { %v1155_v25 = vsel %vm1148_vm10, %v1151_v44, %v1154_v1  ;;  %v640_v26 = vsel %vm633_vm0, %v636_v58, %v639_v19  ;;  %vm1046_vm14 = vcmp.eq.s32.totalorder %v1044_v29, 0  ;;  %v1050_v22 = vxor.u32 2147483648, %v3487_v31  ;;  %v3626_v1 = vld [vmem:[%s3805_s3 + $0x10] sm:$0xff] }
 0x1a2   : > { %v1324_v46 = vsub.s32 %v1320_v15, %v1323_v57  ;;  %v1156_v43 = vsel %vm1146_vm9, nan, %v1155_v25  ;;  %v1048_v48 = vsel %vm1046_vm14, %v3487_v31, %v1047_v28  ;;  %vm1049_vm15 = vcmp.eq.s32.totalorder %v1044_v29, 2 }
 0x1a3   : > { %v1237_v0 = vand.u32 2147483647, %v1236_v63  ;;  %v2420_v13 = vpack.c.bf16 %v1156_v43, %v744_v32  ;;  %vm1045_vm2 = vcmp.lt.s32.totalorder %v1044_v29, 2  ;;  %v1051_v42 = vsel %vm1049_vm15, %v1050_v22, %v3516_v45  ;;  %v3636_v22 = vld [vmem:[%s3805_s3 + $0x18] sm:$0xff] }
 0x1a4   : > { %v1326_v24 = vsub.s32 0, %v1324_v46  ;;  %vm631_vm3 = vweird.f32 %v2909_v27  ;;  %vm1043_vm4 = vweird.f32 %v3093_v3  ;;  %v1052_v47 = vsel %vm1045_vm2, %v1048_v48, %v1051_v42 }
 0x1a5   : > { %v3845_v11 = vand.u32 2147483647, %v3255_v53  ;;  %v3846_v5 = vcvt.s32.f32 %v3253_v51  ;;  %v1239_v21 = vcvt.s32.f32 %v1232_v4  ;;  %2421 = vmatprep.subr.bf16.mxu0 %v2420_v13  ;;  %v641_v31 = vsel %vm631_vm3, nan, %v640_v26 }
 0x1a6   : > { %v1053_v52 = vsel %vm1043_vm4, nan, %v1052_v47  ;;  %v931_v45 = vmul.f32 %v930_v20, %v928_v40  ;;  %v2377_v12 = vmin.u32 %v1326_v24, %v1324_v46  ;;  %vm747_vm5 = vcmp.lt.s32.totalorder %v2915_v33, 0 }
 0x1a7   : > { %v828_v38 = vmul.f32 %v3846_v5, %v3845_v11  ;;  %v2422_v17 = vpack.c.bf16 %v1053_v52, %v641_v31  ;;  %v1240_v27 = vmul.f32 %v1239_v21, %v1237_v0  ;;  %vm850_vm7 = vcmp.lt.s32.totalorder %v2935_v55, 0 }
 0x1a8   : > { %v1328_v61 = vclz %v2377_v12  ;;  %v932_v37 = vxor.u32 2147483648, %v931_v45  ;;  %vm1159_vm8 = vcmp.lt.s32.totalorder %v3238_v59, 0  ;;  %v1316_v20 = vadd.s32 %v3504_v2, %v3510_v39 }
 0x1a9   : > { %2423 = vmatpush1.bf16.msra.mxu0 %v2422_v17  ;;  %v829_v3 = vxor.u32 2147483648, %v828_v38  ;;  %v1241_v8 = vxor.u32 2147483648, %v1240_v27  ;;  %v3847_v60 = vand.u32 2147483647, %v2915_v33  ;;  %v3850_v23 = vand.u32 2147483647, %v2935_v55 }
 0x1aa   : > { %v2378_v53 = vadd.s32 4294967294, %v1328_v61  ;;  %v933_v40 = vsel %vm850_vm7, %v932_v37, %v931_v45  ;;  %vm1391_vm11 = vcmask 130048   ;;  %v3853_v54 = vand.u32 2147483647, %v3238_v59 }
 0x1ab   : > { %v830_v51 = vsel %vm747_vm5, %v829_v3, %v828_v38  ;;  %vm3585_vm9 = vcmp.le.f32.partialorder %v3847_v60, 0.7853982  ;;  %vm3591_vm10 = vcmp.le.f32.partialorder %v3850_v23, 0.7853982  ;;  %v1242_v32 = vsel %vm1159_vm8, %v1241_v8, %v1240_v27 }
 0x1ac   : > { %vm2379_vm6 = vcmp.lt.s32.totalorder %v2378_v53, 0  ;;  %v833_v2 = vsel %vm3585_vm9, %v2915_v33, %v830_v51  ;;  %2380 = vmatmul.mubr.msk.f32.vlgmr.msra.gmra.mrb[4].mxu0 %vm1391_vm11, %v3577_v36  ;;  %v936_v18 = vsel %vm3591_vm10, %v2935_v55, %v933_v40  ;;  %vm3607_vm13 = vcmp.le.f32.partialorder %v3853_v54, 0.7853982 }
 0x1ad   : > { %v1331_v7 = vsel %vm2379_vm6, 0, %v2378_v53  ;;  %v3856_v29 = vmov 0.0   ;;  %v1245_v58 = vsel %vm3607_vm13, %v3238_v59, %v1242_v32  ;;  %2576 = vcosq.f32 %v833_v2 }
 0x1ae   : > { %v1332_v34 = vsub.s32 32, %v1331_v7  ;;  %v1336_v15 = vsub.s32 4294967266, %v1331_v7  ;;  %v1333_v39 = vshll.u32 %v1324_v46, %v1331_v7  ;;  %1474 = vmatprep.mubr.f32.mxu0 %v3856_v29  ;;  %2578 = vcosq.f32 %v936_v18 }
 0x1af   : > { %2580 = vcosq.f32 %v1245_v58  ;;  %v1243_v28 = vsub.s32 4, %v3465_v35  ;;  %v934_v26 = vsub.s32 4, %v3163_v62  ;;  %v831_v46 = vsub.s32 4, %v3095_v16 }
 0x1b0   : > { %v1334_v14 = vshrl.u32 %v1316_v20, %v1332_v34  ;;  %v1337_v30 = vadd.s32 127, %v1336_v15  ;;  %2381 = vmatmul.mubr.msk.f32.gmra.mrb[6].mxu0 %vm1391_vm11, %v3615_v56  ;;  %2582 = vsinq.f32 %v1245_v58  ;;  %vm1262_vm1 = vcmp.lt.s32.totalorder %v3327_v49, 0 }
 0x1b1   : > { %1480 = vmatprep.mubr.f32.mxu0 %v3856_v29  ;;  %2584 = vsinq.f32 %v936_v18  ;;  %v1244_v48 = vsel %vm1159_vm8, %v1243_v28, %v3465_v35  ;;  %v3857_v0 = vand.u32 2147483647, %v3327_v49  ;;  %v1346_v24 = vsub.s32 4, %v3547_v41 }
 0x1b2   : > { %v1335_v19 = vor.u32 %v1334_v14, %v1333_v39  ;;  %v1338_v4 = vshll.u32 %v1337_v30, 23  ;;  %2586 = vsinq.f32 %v833_v2  ;;  %v935_v35 = vsel %vm850_vm7, %v934_v26, %v3163_v62 }
 0x1b3   : > { %vm3645_vm12 = vcmp.le.f32.partialorder %v3857_v0, 0.7853982  ;;  %v832_v38 = vsel %vm747_vm5, %v831_v46, %v3095_v16  ;;  %v1246_v31 = vsel %vm3607_vm13, 0, %v1244_v48  ;;  %v937_v45 = vsel %vm3591_vm10, 0, %v935_v35 }
 0x1b4   : > { %v1339_v63 = vor.u32 4788187, %v1338_v4  ;;  %v1342_v44 = vcvt.s32.f32 %v1335_v19  ;;  %2382 = vmatmul.mubr.msk.f32.gmra.mrb[8].mxu0 %vm1391_vm11, %v3626_v1  ;;  %v1347_v62 = vsel %vm1262_vm1, %v1346_v24, %v3547_v41  ;;  %v834_v17 = vsel %vm3585_vm9, 0, %v832_v38 }
 0x1b5   : > { %1486 = vmatprep.mubr.f32.mxu0 %v3856_v29  ;;  %v1250_v16 = vand.u32 3, %v1246_v31  ;;  %v941_v61 = vand.u32 3, %v937_v45  ;;  %v1349_v3 = vsel %vm3645_vm12, 0, %v1347_v62  ;;  %v838_v7 = vand.u32 3, %v834_v17 }
 0x1b6   : > { %v1340_v57 = vand.u32 2147483647, %v1339_v63  ;;  %v1353_v34 = vand.u32 3, %v1349_v3  ;;  %vm1249_vm13 = vweird.f32 %v3238_v59 }
 0x1b7   : > { %v2577_v47 = vpop.eup %2576  ;;  %vm1252_vm0 = vcmp.eq.s32.totalorder %v1250_v16, 0  ;;  %vm1255_vm14 = vcmp.eq.s32.totalorder %v1250_v16, 2  ;;  %vm943_vm15 = vcmp.eq.s32.totalorder %v941_v61, 0  ;;  %vm946_vm2 = vcmp.eq.s32.totalorder %v941_v61, 2 }
 0x1b8   : > { %v1343_v25 = vmul.f32 %v1342_v44, %v1340_v57  ;;  %2383 = vmatmul.mubr.msk.f32.gmra.mrb[10].mxu0 %vm1391_vm11, %v3636_v22  ;;  %v2579_v5 = vpop.eup %2578  ;;  %v844_v20 = vxor.u32 2147483648, %v2577_v47  ;;  %vm840_vm3 = vcmp.eq.s32.totalorder %v838_v7, 0  ;;  %vm843_vm4 = vcmp.eq.s32.totalorder %v838_v7, 2 }
 0x1b9   : > { %1703 = vmatprep.mubr.f32.mxu0 %v3856_v29  ;;  %v2581_v21 = vpop.eup %2580  ;;  %v947_v51 = vxor.u32 2147483648, %v2579_v5  ;;  %vm1251_vm5 = vcmp.lt.s32.totalorder %v1250_v16, 2  ;;  %vm942_vm6 = vcmp.lt.s32.totalorder %v941_v61, 2  ;;  %vm1358_vm7 = vcmp.eq.s32.totalorder %v1353_v34, 2 }
 0x1ba   : > { %v1344_v43 = vxor.u32 2147483648, %v1343_v25  ;;  %v2583_v52 = vpop.eup %2582  ;;  %v1256_v53 = vxor.u32 2147483648, %v2581_v21  ;;  %vm1355_vm8 = vcmp.eq.s32.totalorder %v1353_v34, 0  ;;  %vm839_vm9 = vcmp.lt.s32.totalorder %v838_v7, 2 }
 0x1bb   : > { %v2585_v12 = vpop.eup %2584  ;;  %v1253_v37 = vxor.u32 2147483648, %v2583_v52  ;;  %vm1354_vm10 = vcmp.lt.s32.totalorder %v1353_v34, 2 }
 0x1bc   : > { %v1345_v42 = vsel %vm1262_vm1, %v1344_v43, %v1343_v25  ;;  %v2587_v27 = vpop.eup %2586  ;;  %v944_v8 = vxor.u32 2147483648, %v2585_v12  ;;  %v1257_v15 = vsel %vm1255_vm14, %v1256_v53, %v2583_v52  ;;  %v948_v23 = vsel %vm946_vm2, %v947_v51, %v2585_v12  ;;  %v1599_v53 = vld [vmem:[%s3807_s5 + $0x8] sm:$0xff] }
 0x1bd   : > { %v1348_v11 = vsel %vm3645_vm12, %v3327_v49, %v1345_v42  ;;  %v841_v40 = vxor.u32 2147483648, %v2587_v27  ;;  %v1254_v41 = vsel %vm1252_vm0, %v2581_v21, %v1253_v37  ;;  %v845_v39 = vsel %vm843_vm4, %v844_v20, %v2587_v27  ;;  %v1598_v37 = vld [vmem:[%s3807_s5] sm:$0xff] }
 0x1be   : > { %2588 = vcosq.f32 %v1348_v11  ;;  %v945_v9 = vsel %vm943_vm15, %v2579_v5, %v944_v8  ;;  %v1258_v30 = vsel %vm1251_vm5, %v1254_v41, %v1257_v15  ;;  %vm940_vm1 = vweird.f32 %v2935_v55 }
 0x1bf   : > { %2590 = vsinq.f32 %v1348_v11  ;;  %v842_v2 = vsel %vm840_vm3, %v2577_v47, %v841_v40  ;;  %v949_v18 = vsel %vm942_vm6, %v945_v9, %v948_v23  ;;  %vm1352_vm12 = vweird.f32 %v3327_v49  ;;  %v1600_v40 = vld [vmem:[%s3807_s5 + $0x10] sm:$0xff] }
 0x1c0   : > { %v846_v58 = vsel %vm839_vm9, %v842_v2, %v845_v39  ;;  %v1259_v4 = vsel %vm1249_vm13, nan, %v1258_v30  ;;  %v950_v63 = vsel %vm940_vm1, nan, %v949_v18  ;;  %vm837_vm0 = vweird.f32 %v2915_v33 }
 0x1c1   : > { %v847_v28 = vsel %vm837_vm0, nan, %v846_v58 }
 0x1c2   : > { %v2426_v25 = vpack.c.bf16 %v1259_v4, %v847_v28 }
 0x1c8   : > { %v2589_v60 = vpop.eup %2588 }
 0x1c9   : > { %v2591_v10 = vpop.eup %2590  ;;  %v1359_v32 = vxor.u32 2147483648, %v2589_v60 }
 0x1ca   : > { %v1356_v14 = vxor.u32 2147483648, %v2591_v10 }
 0x1cb   : > { %v1360_v54 = vsel %vm1358_vm7, %v1359_v32, %v2591_v10 }
 0x1cc   : > { %v1357_v50 = vsel %vm1355_vm8, %v2589_v60, %v1356_v14  ;;  %v1601_v60 = vld [vmem:[%s3807_s5 + $0x18] sm:$0xff] }
 0x1cd   : > { %v1361_v19 = vsel %vm1354_vm10, %v1357_v50, %v1360_v54 }
 0x1ce   : > { %v1362_v57 = vsel %vm1352_vm12, nan, %v1361_v19 }
 0x1cf   : > { %v2424_v44 = vpack.c.bf16 %v1362_v57, %v950_v63 }
 0x1d1   : > { %2425 = vmatprep.subr.bf16.mxu1 %v2424_v44 }
 0x1d2   : > { %2427 = vmatpush1.bf16.msra.mxu1 %v2426_v25 }
 0x1d5   : > { %2384 = vmatmul.mubr.msk.f32.vlgmr.msra.gmra.mrb[4].mxu1 %vm1391_vm11, %v3577_v36 }
 0x1d6   : > { %1563 = vmatprep.mubr.f32.mxu1 %v3856_v29 }
 0x1d9   : > { %2385 = vmatmul.mubr.msk.f32.gmra.mrb[6].mxu1 %vm1391_vm11, %v3615_v56 }
 0x1da   : > { %1569 = vmatprep.mubr.f32.mxu1 %v3856_v29 }
 0x1db   : > { %v1374_v33 = vpop.permute.xlu1 %1373 }
 0x1dd   : > { %2386 = vmatmul.mubr.msk.f32.gmra.mrb[8].mxu1 %vm1391_vm11, %v3626_v1  ;;  %v1384_v1 = vpop.permute.xlu0 %1383 }
 0x1de   : > { %1575 = vmatprep.mubr.f32.mxu1 %v3856_v29 }
 0x1df   : > { %v1379_v26 = vpop.permute.xlu1 %1378 }
 0x1e1   : > { %2387 = vmatmul.mubr.msk.f32.gmra.mrb[10].mxu1 %vm1391_vm11, %v3636_v22  ;;  %vm1626_vm11 = vcmask 261120  }
 0x1e2   : > { %1792 = vmatprep.mubr.f32.mxu1 %v3856_v29 }
 0x1e3   : > { %v1389_v24 = vpop.permute.xlu1 %1388 }
 0x27f   : > { %v1470_v55 = vpop.f32.mrb[4].mxu0 }
 0x280   : > { %v1471_v59 = vadd.f32 %v1470_v55, %v1374_v33  ;;  %v1472_v49 = vpop.f32.mrb[5].mxu0 }
 0x281   : > { %v1473_v36 = vadd.f32 %v1472_v49, %v1374_v33 }
 0x282   : > { %2592 = vtanh.f32 %v1471_v59  ;;  %v1609_v59 = vpop.permute.xlu0 %1608 }
 0x283   : > { %v1476_v46 = vpop.f32.mrb[6].mxu0  ;;  %2594 = vtanh.f32 %v1473_v36 }
 0x284   : > { %v1477_v56 = vadd.f32 %v1476_v46, %v1379_v26  ;;  %v1478_v43 = vpop.f32.mrb[7].mxu0 }
 0x285   : > { %v1479_v48 = vadd.f32 %v1478_v43, %v1379_v26 }
 0x286   : > { %2596 = vtanh.f32 %v1477_v56  ;;  %v1614_v56 = vpop.permute.xlu1 %1613 }
 0x287   : > { %2598 = vtanh.f32 %v1479_v48  ;;  %v1482_v0 = vpop.f32.mrb[8].mxu0 }
 0x288   : > { %v1483_v13 = vadd.f32 %v1482_v0, %v1384_v1  ;;  %v1484_v22 = vpop.f32.mrb[9].mxu0 }
 0x289   : > { %v1485_v42 = vadd.f32 %v1484_v22, %v1384_v1 }
 0x28a   : > { %2600 = vtanh.f32 %v1483_v13  ;;  %v1619_v13 = vpop.permute.xlu0 %1618 }
 0x28b   : > { %v1488_v47 = vpop.f32.mrb[10].mxu0  ;;  %2602 = vtanh.f32 %v1485_v42 }
 0x28c   : > { %v1489_v11 = vadd.f32 %v1488_v47, %v1389_v24  ;;  %v1490_v35 = vpop.f32.mrb[11].mxu0  ;;  %v2593_v38 = vpop.eup %2592 }
 0x28d   : > { %v1491_v5 = vadd.f32 %v1490_v35, %v1389_v24  ;;  %v2595_v21 = vpop.eup %2594 }
 0x28e   : > { %2604 = vtanh.f32 %v1489_v11  ;;  %v1624_v11 = vpop.permute.xlu1 %1623 }
 0x28f   : > { %2606 = vtanh.f32 %v1491_v5 }
 0x290   : > { %v2597_v31 = vpop.eup %2596 }
 0x291   : > { %v2599_v52 = vpop.eup %2598  ;;  %v2430_v45 = vpack.c.bf16 %v2597_v31, %v2593_v38 }
 0x292   : > { %v2428_v62 = vpack.c.bf16 %v2599_v52, %v2595_v21 }
 0x294   : > { %2429 = vmatprep.subr.bf16.mxu0 %v2428_v62  ;;  %v2601_v12 = vpop.eup %2600 }
 0x295   : > { %2431 = vmatpush1.bf16.msra.mxu0 %v2430_v45  ;;  %v2603_v17 = vpop.eup %2602 }
 0x298   : > { %v2605_v27 = vpop.eup %2604 }
 0x299   : > { %v2607_v16 = vpop.eup %2606  ;;  %v2434_v61 = vpack.c.bf16 %v2605_v27, %v2601_v12 }
 0x29a   : > { %v2432_v3 = vpack.c.bf16 %v2607_v16, %v2603_v17 }
 0x29c   : > { %2433 = vmatprep.subr.bf16.mxu0 %v2432_v3 }
 0x29d   : > { %2435 = vmatpush1.bf16.msra.mxu0 %v2434_v61 }
 0x2a0   : > { %2388 = vmatmul.mubr.msk.f32.vlgmr.msra.gmra.mrb[12].mxu0 %vm1626_vm11, %v1598_v37 }
 0x2a1   : > { %1709 = vmatprep.mubr.f32.mxu0 %v3856_v29 }
 0x2a4   : > { %2389 = vmatmul.mubr.msk.f32.gmra.mrb[14].mxu0 %vm1626_vm11, %v1599_v53 }
 0x2a5   : > { %1715 = vmatprep.mubr.f32.mxu0 %v3856_v29 }
 0x2a8   : > { %v1559_v8 = vpop.f32.mrb[4].mxu1  ;;  %2390 = vmatmul.mubr.msk.f32.gmra.mrb[16].mxu0 %vm1626_vm11, %v1600_v40 }
 0x2a9   : > { %v1560_v51 = vadd.f32 %v1559_v8, %v1374_v33  ;;  %v1561_v7 = vpop.f32.mrb[5].mxu1  ;;  %1721 = vmatprep.mubr.f32.mxu0 %v3856_v29  ;;  %v2396_v8 = vld [vmem:[%s3807_s5 + $0x20] sm:$0xff] }
 0x2aa   : > { %v1562_v20 = vadd.f32 %v1561_v7, %v1374_v33 }
 0x2ab   : > { %2608 = vtanh.f32 %v1560_v51  ;;  %v2397_v51 = vld [vmem:[%s3807_s5 + $0x28] sm:$0xff] }
 0x2ac   : > { %v1565_v34 = vpop.f32.mrb[6].mxu1  ;;  %2610 = vtanh.f32 %v1562_v20  ;;  %2391 = vmatmul.mubr.msk.f32.gmra.mrb[18].mxu0 %vm1626_vm11, %v1601_v60 }
 0x2ad   : > { %v1566_v41 = vadd.f32 %v1565_v34, %v1379_v26  ;;  %v1567_v15 = vpop.f32.mrb[7].mxu1  ;;  %1939 = vmatprep.mubr.f32.mxu0 %v3856_v29  ;;  %v2398_v34 = vld [vmem:[%s3807_s5 + $0x30] sm:$0xff] }
 0x2ae   : > { %v1568_v9 = vadd.f32 %v1567_v15, %v1379_v26 }
 0x2af   : > { %2612 = vtanh.f32 %v1566_v41 }
 0x2b0   : > { %2614 = vtanh.f32 %v1568_v9  ;;  %v1571_v23 = vpop.f32.mrb[8].mxu1 }
 0x2b1   : > { %v1572_v10 = vadd.f32 %v1571_v23, %v1384_v1  ;;  %v1573_v32 = vpop.f32.mrb[9].mxu1  ;;  %v2399_v23 = vld [vmem:[%s3807_s5 + $0x38] sm:$0xff] }
 0x2b2   : > { %v1574_v2 = vadd.f32 %v1573_v32, %v1384_v1 }
 0x2b3   : > { %2616 = vtanh.f32 %v1572_v10 }
 0x2b4   : > { %v1577_v39 = vpop.f32.mrb[10].mxu1  ;;  %2618 = vtanh.f32 %v1574_v2 }
 0x2b5   : > { %v1578_v14 = vadd.f32 %v1577_v39, %v1389_v24  ;;  %v1579_v30 = vpop.f32.mrb[11].mxu1  ;;  %v2609_v54 = vpop.eup %2608 }
 0x2b6   : > { %v1580_v18 = vadd.f32 %v1579_v30, %v1389_v24  ;;  %v2611_v50 = vpop.eup %2610 }
 0x2b7   : > { %2620 = vtanh.f32 %v1578_v14 }
 0x2b8   : > { %2622 = vtanh.f32 %v1580_v18 }
 0x2b9   : > { %v2613_v58 = vpop.eup %2612 }
 0x2ba   : > { %v2615_v19 = vpop.eup %2614  ;;  %v2438_v4 = vpack.c.bf16 %v2613_v58, %v2609_v54 }
 0x2bb   : > { %v2436_v63 = vpack.c.bf16 %v2615_v19, %v2611_v50 }
 0x2bd   : > { %2437 = vmatprep.subr.bf16.mxu1 %v2436_v63  ;;  %v2617_v57 = vpop.eup %2616 }
 0x2be   : > { %2439 = vmatpush1.bf16.msra.mxu1 %v2438_v4  ;;  %v2619_v44 = vpop.eup %2618 }
 0x2c1   : > { %v2621_v28 = vpop.eup %2620 }
 0x2c2   : > { %v2623_v25 = vpop.eup %2622  ;;  %v2442_v33 = vpack.c.bf16 %v2621_v28, %v2617_v57 }
 0x2c3   : > { %v2440_v55 = vpack.c.bf16 %v2623_v25, %v2619_v44 }
 0x2c5   : > { %2441 = vmatprep.subr.bf16.mxu1 %v2440_v55 }
 0x2c6   : > { %2443 = vmatpush1.bf16.msra.mxu1 %v2442_v33 }
 0x2c9   : > { %2392 = vmatmul.mubr.msk.f32.vlgmr.msra.gmra.mrb[12].mxu1 %vm1626_vm11, %v1598_v37 }
 0x2ca   : > { %1798 = vmatprep.mubr.f32.mxu1 %v3856_v29 }
 0x2cd   : > { %2393 = vmatmul.mubr.msk.f32.gmra.mrb[14].mxu1 %vm1626_vm11, %v1599_v53 }
 0x2ce   : > { %1804 = vmatprep.mubr.f32.mxu1 %v3856_v29 }
 0x2d1   : > { %2394 = vmatmul.mubr.msk.f32.gmra.mrb[16].mxu1 %vm1626_vm11, %v1600_v40 }
 0x2d2   : > { %1810 = vmatprep.mubr.f32.mxu1 %v3856_v29 }
 0x2d5   : > { %2395 = vmatmul.mubr.msk.f32.gmra.mrb[18].mxu1 %vm1626_vm11, %v1601_v60 }
 0x2d6   : > { %2028 = vmatprep.mubr.f32.mxu1 %v3856_v29 }
 0x373   : > { %v1705_v49 = vpop.f32.mrb[12].mxu0 }
 0x374   : > { %v1706_v36 = vadd.f32 %v1705_v49, %v1609_v59  ;;  %v1707_v26 = vpop.f32.mrb[13].mxu0 }
 0x375   : > { %v1708_v46 = vadd.f32 %v1707_v26, %v1609_v59 }
 0x376   : > { %2624 = vtanh.f32 %v1706_v36  ;;  %v1846_v36 = vpop.permute.xlu0 %1845 }
 0x377   : > { %v1711_v43 = vpop.f32.mrb[14].mxu0  ;;  %2626 = vtanh.f32 %v1708_v46 }
 0x378   : > { %v1712_v48 = vadd.f32 %v1711_v43, %v1614_v56  ;;  %v1713_v1 = vpop.f32.mrb[15].mxu0 }
 0x379   : > { %v1714_v0 = vadd.f32 %v1713_v1, %v1614_v56 }
 0x37a   : > { %2628 = vtanh.f32 %v1712_v48  ;;  %v1851_v48 = vpop.permute.xlu1 %1850 }
 0x37b   : > { %2630 = vtanh.f32 %v1714_v0  ;;  %v1717_v22 = vpop.f32.mrb[16].mxu0 }
 0x37c   : > { %v1718_v42 = vadd.f32 %v1717_v22, %v1619_v13  ;;  %v1719_v24 = vpop.f32.mrb[17].mxu0 }
 0x37d   : > { %v1720_v47 = vadd.f32 %v1719_v24, %v1619_v13 }
 0x37e   : > { %2632 = vtanh.f32 %v1718_v42  ;;  %v1856_v42 = vpop.permute.xlu0 %1855 }
 0x37f   : > { %v1723_v35 = vpop.f32.mrb[18].mxu0  ;;  %2634 = vtanh.f32 %v1720_v47 }
 0x380   : > { %v1724_v5 = vadd.f32 %v1723_v35, %v1624_v11  ;;  %v1725_v38 = vpop.f32.mrb[19].mxu0  ;;  %v2625_v31 = vpop.eup %2624 }
 0x381   : > { %v1726_v21 = vadd.f32 %v1725_v38, %v1624_v11  ;;  %v2627_v52 = vpop.eup %2626 }
 0x382   : > { %2636 = vtanh.f32 %v1724_v5 }
 0x383   : > { %2638 = vtanh.f32 %v1726_v21 }
 0x384   : > { %v2629_v45 = vpop.eup %2628 }
 0x385   : > { %v2631_v62 = vpop.eup %2630  ;;  %v2446_v12 = vpack.c.bf16 %v2629_v45, %v2625_v31 }
 0x386   : > { %v2444_v17 = vpack.c.bf16 %v2631_v62, %v2627_v52 }
 0x388   : > { %2445 = vmatprep.subr.bf16.mxu0 %v2444_v17  ;;  %v2633_v27 = vpop.eup %2632 }
 0x389   : > { %2447 = vmatpush1.bf16.msra.mxu0 %v2446_v12  ;;  %v2635_v16 = vpop.eup %2634 }
 0x38c   : > { %v2637_v61 = vpop.eup %2636 }
 0x38d   : > { %v2639_v3 = vpop.eup %2638  ;;  %v2450_v37 = vpack.c.bf16 %v2637_v61, %v2633_v27 }
 0x38e   : > { %v2448_v53 = vpack.c.bf16 %v2639_v3, %v2635_v16 }
 0x390   : > { %2449 = vmatprep.subr.bf16.mxu0 %v2448_v53 }
 0x391   : > { %2451 = vmatpush1.bf16.msra.mxu0 %v2450_v37 }
 0x394   : > { %2404 = vmatmul.mubr.msk.f32.vlgmr.msra.gmra.mrb[20].mxu0 %vm1626_vm11, %v2396_v8 }
 0x395   : > { %1945 = vmatprep.mubr.f32.mxu0 %v3856_v29 }
 0x398   : > { %2405 = vmatmul.mubr.msk.f32.gmra.mrb[22].mxu0 %vm1626_vm11, %v2397_v51 }
 0x399   : > { %1951 = vmatprep.mubr.f32.mxu0 %v3856_v29 }
 0x39c   : > { %v1794_v7 = vpop.f32.mrb[12].mxu1  ;;  %2406 = vmatmul.mubr.msk.f32.gmra.mrb[24].mxu0 %vm1626_vm11, %v2398_v34 }
 0x39d   : > { %v1795_v40 = vadd.f32 %v1794_v7, %v1609_v59  ;;  %v1796_v20 = vpop.f32.mrb[13].mxu1  ;;  %1957 = vmatprep.mubr.f32.mxu0 %v3856_v29 }
 0x39e   : > { %v1797_v41 = vadd.f32 %v1796_v20, %v1609_v59 }
 0x39f   : > { %2640 = vtanh.f32 %v1795_v40 }
 0x3a0   : > { %v1800_v15 = vpop.f32.mrb[14].mxu1  ;;  %2642 = vtanh.f32 %v1797_v41  ;;  %2407 = vmatmul.mubr.msk.f32.gmra.mrb[26].mxu0 %vm1626_vm11, %v2399_v23 }
 0x3a1   : > { %v1801_v60 = vadd.f32 %v1800_v15, %v1614_v56  ;;  %v1802_v9 = vpop.f32.mrb[15].mxu1  ;;  %2147 = vmatprep.mubr.f32.mxu0 %v3856_v29 }
 0x3a2   : > { %v1803_v10 = vadd.f32 %v1802_v9, %v1614_v56 }
 0x3a3   : > { %2644 = vtanh.f32 %v1801_v60 }
 0x3a4   : > { %2646 = vtanh.f32 %v1803_v10  ;;  %v1806_v32 = vpop.f32.mrb[16].mxu1 }
 0x3a5   : > { %v1807_v2 = vadd.f32 %v1806_v32, %v1619_v13  ;;  %v1808_v39 = vpop.f32.mrb[17].mxu1 }
 0x3a6   : > { %v1809_v14 = vadd.f32 %v1808_v39, %v1619_v13 }
 0x3a7   : > { %2648 = vtanh.f32 %v1807_v2 }
 0x3a8   : > { %v1812_v30 = vpop.f32.mrb[18].mxu1  ;;  %2650 = vtanh.f32 %v1809_v14 }
 0x3a9   : > { %v1813_v18 = vadd.f32 %v1812_v30, %v1624_v11  ;;  %v1814_v54 = vpop.f32.mrb[19].mxu1  ;;  %v2641_v58 = vpop.eup %2640 }
 0x3aa   : > { %v1815_v50 = vadd.f32 %v1814_v54, %v1624_v11  ;;  %v2643_v19 = vpop.eup %2642 }
 0x3ab   : > { %2652 = vtanh.f32 %v1813_v18 }
 0x3ac   : > { %2654 = vtanh.f32 %v1815_v50 }
 0x3ad   : > { %v2645_v4 = vpop.eup %2644 }
 0x3ae   : > { %v2647_v63 = vpop.eup %2646  ;;  %v2454_v57 = vpack.c.bf16 %v2645_v4, %v2641_v58 }
 0x3af   : > { %v2452_v44 = vpack.c.bf16 %v2647_v63, %v2643_v19 }
 0x3b1   : > { %2453 = vmatprep.subr.bf16.mxu1 %v2452_v44  ;;  %v2649_v28 = vpop.eup %2648 }
 0x3b2   : > { %2455 = vmatpush1.bf16.msra.mxu1 %v2454_v57  ;;  %v2651_v25 = vpop.eup %2650 }
 0x3b5   : > { %v2653_v33 = vpop.eup %2652 }
 0x3b6   : > { %v2655_v55 = vpop.eup %2654  ;;  %v2458_v59 = vpack.c.bf16 %v2653_v33, %v2649_v28 }
 0x3b7   : > { %v2456_v49 = vpack.c.bf16 %v2655_v55, %v2651_v25 }
 0x3b9   : > { %2457 = vmatprep.subr.bf16.mxu1 %v2456_v49  ;;  %v2074_v49 = vpop.permute.xlu0 %2073 }
 0x3ba   : > { %2459 = vmatpush1.bf16.msra.mxu1 %v2458_v59  ;;  %v2078_v59 = vsub.s32 0, %v2871_v6 }
 0x3bd   : > { %2408 = vmatmul.mubr.msk.f32.vlgmr.msra.gmra.mrb[20].mxu1 %vm1626_vm11, %v2396_v8 }
 0x3be   : > { %2034 = vmatprep.mubr.f32.mxu1 %v3856_v29 }
 0x3c1   : > { %2409 = vmatmul.mubr.msk.f32.gmra.mrb[22].mxu1 %vm1626_vm11, %v2397_v51  ;;  %v2069_v51 = vld [vmem:[%s3809_s7] sm:$0x1] }
 0x3c2   : > { %2040 = vmatprep.mubr.f32.mxu1 %v3856_v29 }
 0x3c5   : > { %2410 = vmatmul.mubr.msk.f32.gmra.mrb[24].mxu1 %vm1626_vm11, %v2398_v34 }
 0x3c6   : > { %2046 = vmatprep.mubr.f32.mxu1 %v3856_v29 }
 0x3c9   : > { %2411 = vmatmul.mubr.msk.f32.gmra.mrb[26].mxu1 %vm1626_vm11, %v2399_v23 }
 0x3ca   : > { %2218 = vmatprep.mubr.f32.mxu1 %v3856_v29  ;;  %v1861_v29 = vpop.permute.xlu1 %1860 }
 0x467   : > { %v1941_v26 = vpop.f32.mrb[20].mxu0 }
 0x468   : > { %v1942_v46 = vadd.f32 %v1941_v26, %v1846_v36  ;;  %v1943_v56 = vpop.f32.mrb[21].mxu0 }
 0x469   : > { %v1944_v43 = vadd.f32 %v1943_v56, %v1846_v36 }
 0x46a   : > { %2656 = vtanh.f32 %v1942_v46 }
 0x46b   : > { %v1947_v1 = vpop.f32.mrb[22].mxu0  ;;  %2658 = vtanh.f32 %v1944_v43 }
 0x46c   : > { %v1948_v0 = vadd.f32 %v1947_v1, %v1851_v48  ;;  %v1949_v13 = vpop.f32.mrb[23].mxu0  ;;  %v2761_v1 = vmov 1966171168  }
 0x46d   : > { %v1950_v22 = vadd.f32 %v1949_v13, %v1851_v48 }
 0x46e   : > { %2660 = vtanh.f32 %v1948_v0  ;;  %v2232_v0 = vunpack.c.l.s4 %v2761_v1 }
 0x46f   : > { %2662 = vtanh.f32 %v1950_v22  ;;  %v1953_v24 = vpop.f32.mrb[24].mxu0 }
 0x470   : > { %v1954_v47 = vadd.f32 %v1953_v24, %v1856_v42  ;;  %v1955_v11 = vpop.f32.mrb[25].mxu0  ;;  %v2233_v13 = vunpack.c.0.s8 %v2232_v0 }
 0x471   : > { %v1956_v35 = vadd.f32 %v1955_v11, %v1856_v42 }
 0x472   : > { %2664 = vtanh.f32 %v1954_v47  ;;  %v2236_v47 = vsub.s32 %v2233_v13, %v2871_v6 }
 0x473   : > { %v1959_v5 = vpop.f32.mrb[26].mxu0  ;;  %2666 = vtanh.f32 %v1956_v35 }
 0x474   : > { %v1960_v38 = vadd.f32 %v1959_v5, %v1861_v29  ;;  %v1961_v21 = vpop.f32.mrb[27].mxu0  ;;  %v2657_v52 = vpop.eup %2656 }
 0x475   : > { %v1962_v31 = vadd.f32 %v1961_v21, %v1861_v29  ;;  %v2659_v45 = vpop.eup %2658  ;;  %v3860_v21 = vlaneseq }
 0x476   : > { %2668 = vtanh.f32 %v1960_v38 }
 0x477   : > { %2670 = vtanh.f32 %v1962_v31  ;;  %vm2256_vm14 = vcmp.lt.s32.totalorder %v3860_v21, 512 }
 0x478   : > { %v2661_v62 = vpop.eup %2660 }
 0x479   : > { %v2663_v12 = vpop.eup %2662  ;;  %v2462_v17 = vpack.c.bf16 %v2661_v62, %v2657_v52 }
 0x47a   : > { %v2460_v27 = vpack.c.bf16 %v2663_v12, %v2659_v45 }
 0x47c   : > { %2461 = vmatprep.subr.bf16.mxu0 %v2460_v27  ;;  %v2665_v16 = vpop.eup %2664 }
 0x47d   : > { %2463 = vmatpush1.bf16.msra.mxu0 %v2462_v17  ;;  %v2667_v61 = vpop.eup %2666 }
 0x480   : > { %v2669_v3 = vpop.eup %2668 }
 0x481   : > { %v2671_v37 = vpop.eup %2670  ;;  %v2466_v53 = vpack.c.bf16 %v2669_v3, %v2665_v16 }
 0x482   : > { %v2464_v8 = vpack.c.bf16 %v2671_v37, %v2667_v61 }
 0x484   : > { %2465 = vmatprep.subr.bf16.mxu0 %v2464_v8 }
 0x485   : > { %2467 = vmatpush1.bf16.msra.mxu0 %v2466_v53 }
 0x488   : > { %2412 = vmatmul.mubr.msk.f32.vlgmr.msra.gmra.mrb[28].mxu0 %vm1626_vm11, %v2069_v51 }
 0x490   : > { %v2030_v7 = vpop.f32.mrb[20].mxu1 }
 0x491   : > { %v2031_v40 = vadd.f32 %v2030_v7, %v1846_v36  ;;  %v2032_v20 = vpop.f32.mrb[21].mxu1 }
 0x492   : > { %v2033_v34 = vadd.f32 %v2032_v20, %v1846_v36  ;;  %v2079_v36 = vrot.slane %v2074_v49, %v2078_v59 }
 0x493   : > { %2672 = vtanh.f32 %v2031_v40 }
 0x494   : > { %v2036_v41 = vpop.f32.mrb[22].mxu1  ;;  %2674 = vtanh.f32 %v2033_v34 }
 0x495   : > { %v2037_v15 = vadd.f32 %v2036_v41, %v1851_v48  ;;  %v2038_v60 = vpop.f32.mrb[23].mxu1 }
 0x496   : > { %v2039_v9 = vadd.f32 %v2038_v60, %v1851_v48 }
 0x497   : > { %2676 = vtanh.f32 %v2037_v15 }
 0x498   : > { %2678 = vtanh.f32 %v2039_v9  ;;  %v2042_v23 = vpop.f32.mrb[24].mxu1 }
 0x499   : > { %v2043_v10 = vadd.f32 %v2042_v23, %v1856_v42  ;;  %v2044_v32 = vpop.f32.mrb[25].mxu1 }
 0x49a   : > { %v2045_v2 = vadd.f32 %v2044_v32, %v1856_v42 }
 0x49b   : > { %2680 = vtanh.f32 %v2043_v10 }
 0x49c   : > { %v2048_v39 = vpop.f32.mrb[26].mxu1  ;;  %2682 = vtanh.f32 %v2045_v2 }
 0x49d   : > { %v2049_v14 = vadd.f32 %v2048_v39, %v1861_v29  ;;  %v2050_v30 = vpop.f32.mrb[27].mxu1  ;;  %v2673_v54 = vpop.eup %2672 }
 0x49e   : > { %v2051_v18 = vadd.f32 %v2050_v30, %v1861_v29  ;;  %v2675_v50 = vpop.eup %2674 }
 0x49f   : > { %2684 = vtanh.f32 %v2049_v14 }
 0x4a0   : > { %2686 = vtanh.f32 %v2051_v18 }
 0x4a1   : > { %v2677_v58 = vpop.eup %2676 }
 0x4a2   : > { %v2679_v19 = vpop.eup %2678  ;;  %v2470_v4 = vpack.c.bf16 %v2677_v58, %v2673_v54 }
 0x4a3   : > { %v2468_v63 = vpack.c.bf16 %v2679_v19, %v2675_v50 }
 0x4a5   : > { %2469 = vmatprep.subr.bf16.mxu1 %v2468_v63  ;;  %v2681_v57 = vpop.eup %2680 }
 0x4a6   : > { %2471 = vmatpush1.bf16.msra.mxu1 %v2470_v4  ;;  %v2683_v44 = vpop.eup %2682 }
 0x4a9   : > { %v2685_v28 = vpop.eup %2684 }
 0x4aa   : > { %v2687_v25 = vpop.eup %2686  ;;  %v2474_v33 = vpack.c.bf16 %v2685_v28, %v2681_v57 }
 0x4ab   : > { %v2472_v55 = vpack.c.bf16 %v2687_v25, %v2683_v44 }
 0x4ad   : > { %2473 = vmatprep.subr.bf16.mxu1 %v2472_v55 }
 0x4ae   : > { %2475 = vmatpush1.bf16.msra.mxu1 %v2474_v33 }
 0x4b1   : > { %2413 = vmatmul.mubr.msk.f32.vlgmr.msra.gmra.mrb[28].mxu1 %vm1626_vm11, %v2069_v51 }
 0x55b   : > { %v2149_v26 = vpop.f32.mrb[28].mxu0 }
 0x55c   : > { %v2150_v46 = vadd.f32 %v2149_v26, %v2079_v36  ;;  %v2151_v56 = vpop.f32.mrb[29].mxu0 }
 0x55d   : > { %v2152_v43 = vadd.f32 %v2151_v56, %v2079_v36 }
 0x55f   : > { %v2229_v48 = vcombine.low %v2150_v46, %v2152_v43 }
 0x561   : > { %v2237_v29 = vrot.slane %v2229_v48, %v2236_v47 }
 0x584   : > { %v2220_v22 = vpop.f32.mrb[28].mxu1 }
 0x585   : > { %v2221_v42 = vadd.f32 %v2220_v22, %v2079_v36  ;;  %v2222_v24 = vpop.f32.mrb[29].mxu1 }
 0x586   : > { %v2223_v11 = vadd.f32 %v2222_v24, %v2079_v36 }
 0x588   : > { %v2230_v35 = vcombine.low %v2221_v42, %v2223_v11 }
 0x58a   : > { %v2244_v5 = vrot.slane %v2230_v35, %v2236_v47 }
 0x58c   : > { %v2245_v38 = vcombine.low %v2237_v29, %v2244_v5 }
 0x58e   : > { %v2252_v31 = vrot.slane %v2245_v38, %v2236_v47 }
 0x590   : > { %2258 = vst.msk [vmem:[%s328_s23] sm:$0xf] %vm2256_vm14, %v2252_v31 }
 0x591   : > { %2701 = shalt.err (!%p2698_p3)
}
 0x592   : > { %s2702_s15 = scalar_lea.hbm %s3760_s27, 64  ;;  %s2706_s22 = scalar_lea.hbm %s3811_s9, 128 }
 0x593   : > { %p2703_p4 = scmp.ne.s32.totalorder %s3760_s27, %s2702_s15  ;;  %p2707_p9 = scmp.lt.u32.totalorder %s3760_s27, %s3811_s9 }
 0x594   : > { %p2708_p10 = scmp.lt.u32.totalorder %s2706_s22, %s2702_s15  ;;  %p2710_p12 = scmp.lt.u32.totalorder %s2702_s15, %s3760_s27 }
 0x595   : > { %p2704_p7 = pnand %p2703_p4, %p2854_p5 }
 0x596   : > { %p2709_p11 = por %p2708_p10, %p2707_p9 }
 0x597   : > { %p2705_p8 = pneg %p2704_p7 }
 0x598   : > { %p2711_p13 = por %p2710_p12, %p2709_p11 }
 0x59a   : > { %p2712_p0 = pnand %p2711_p13, %p2705_p8 }
 0x59c   : > { %2715 = shalt.err (!%p2712_p0)
}
 0x59d   : > { %2508 = dma.vmem_to_hbm [thread:$0]  (%p2854_p5), %s3762_s24, 64, %s3760_s27, %s2260_s28  }
 0x59e PF: > { %p2514_p1 = scmp.ge.s32.totalorder %s2750_s14, 2  ;;  %s2286_s26 = sand.u32 1, %s2738_s11  }
 0x59f   : > { %s2287_s29 = scalar_lea.sflag [#allocation4], %s2286_s26 }
 0x5a0   : > { %p2511_p2 = pnand %p2514_p1, %p2858_p6 }
 0x5a2   : > { %2733 = dma.done.wait (!%p2511_p2), %s2287_s29, 64  }
 0x5a3   : > { %2735 = vsyncadd (!%p2511_p2), %s2287_s29, 4294967232  ;;  %p21_p3 = scmp.ge.s32.totalorder %s2841_s16, 4   ;;  %s3861_s11 = smov %s2742_s12 }
 0x5a4   : > { %s3862_s12 = smov %s2746_s13  ;;  %s3863_s13 = smov %s2852_s19 }
 0x5a5   : > { %s3864_s14 = smov %s2841_s16  ;;  %23 = sbr.rel (!%p21_p3) target bundleno = 6 (0x6), region = 93 }
 0x5ac   :  { %2292 = vsyncpa [#allocation4], 1 }
 0x5ad   :  { %2294 = vsyncpa [#allocation4 + $0x1], 1 }

</bundles_post_ra>
